<compile_context>
chip_gen: v7x
topology: tpu7x:2x2x1
jax: 0.10.0
libtpu: 0.0.40
codegen_flags: <defaults>
</compile_context>

<pallas_src>
import functools

import jax
import jax.numpy as jnp
from jax import lax
from jax.experimental import pallas as pl
from jax.experimental.pallas import tpu as pltpu

INPUT_DIM = 16
NUM_OSC = 8          # N
D = 32               # d
NUM_STEPS = 10
NUM_CLASSES = 4
BATCH = 2


def _slab_layout(N, B, IN, d, C):
    """Row offsets of the packed parameter slab (lane width LW)."""
    NB = N * B
    LW = max(d, 2 * NB, NB, C, N * IN)          # 128 for the default config
    off, r = {}, 0
    for name, nrows in (("wfc", N * IN), ("bfc", NB), ("wki", NB),
                        ("rhs", d + 2 * NB), ("vrc", d), ("avg", B),
                        ("bias", 1), ("mask", NB), ("tile", IN)):
        off[name] = r
        r += nrows
    return off, r, LW


# -----------------------------------------------------------------------------
# Fused kernel: fc -> AKOrN block -> readout -> classifier (whole batch at once)
# -----------------------------------------------------------------------------
def akorn_fused_kernel(x_ref, slab_ref, eta_ref, out_ref, lhs_scr, rhs_scr, *,
                       num_steps, num_osc, batch, input_dim, d, num_classes):
    N, B, IN, C = num_osc, batch, input_dim, num_classes
    NB = N * B
    off, _, _ = _slab_layout(N, B, IN, d, C)
    f32 = jnp.float32

    eta = eta_ref[0, 0]                                        # SMEM scalar
    eta2 = eta * eta

    # ---- fc: Linear(IN -> N*d) produced directly in oscillator-major (N*B, d)
    #      layout. kron(I_N, x) = (row_tile(x) @ tile_mat) * blockdiag_mask, so
    #      x0 = kron(I_N, x) @ vstack_n(fc_w_n) + fc_b is one real matmul.
    xin = x_ref[...]                                           # (B, IN)
    xrep = jnp.concatenate([xin] * N, axis=0)                  # (NB, IN)
    tile_mat = slab_ref[pl.ds(off["tile"], IN), pl.ds(0, N * IN)]    # (IN, N*IN)
    mask = slab_ref[pl.ds(off["mask"], NB), pl.ds(0, N * IN)]        # (NB, N*IN)
    kx = jnp.dot(xrep, tile_mat, preferred_element_type=f32) * mask  # kron(I_N, x)

    wfc = slab_ref[pl.ds(off["wfc"], N * IN), pl.ds(0, d)]     # (N*IN, d)
    bfc = slab_ref[pl.ds(off["bfc"], NB), pl.ds(0, d)]         # (NB, d)
    x0 = jnp.dot(kx, wfc, preferred_element_type=f32) + bfc    # (NB, d)

    # F.normalize(p=2, dim=-1, eps=1e-12)
    ss0 = jnp.sum(x0 * x0, axis=-1, keepdims=True)
    x = x0 * lax.rsqrt(jnp.maximum(ss0, 1e-24))

    # ---- static halves of the merged per-step operands (written once).
    # LHS (NB, d+2NB) = [ x | kron(W,I_B) | I_NB ],  RHS (d+2NB, d) = [Omega; x; h]
    # => LHS @ RHS = x@Omega + kron(W,I_B)@x + h = drive   (one MXU op / step)
    lhs_scr[:, pl.ds(d, 2 * NB)] = slab_ref[pl.ds(off["wki"], NB), pl.ds(0, 2 * NB)]
    rhs_scr[...] = slab_ref[pl.ds(off["rhs"], d + 2 * NB), pl.ds(0, d)]

    # ---- Kuramoto updates (static, unrolled).
    for _ in range(num_steps):
        lhs_scr[:, pl.ds(0, d)] = x
        rhs_scr[pl.ds(d, NB), :] = x
        drive = jnp.dot(lhs_scr[...], rhs_scr[...], preferred_element_type=f32)
        dot = jnp.sum(x * drive, axis=-1, keepdims=True)       # x . drive
        dsq = jnp.sum(drive * drive, axis=-1, keepdims=True)   # ||drive||^2
        # ||x|| == 1  =>  ||x + eta*(drive - dot*x)||^2 = 1 + eta^2*(dsq - dot^2)
        inv = lax.rsqrt(1.0 + eta2 * (dsq - dot * dot))
        x = (x + eta * (drive - dot * x)) * inv

    # ---- fused readout + classifier: logits = (avg @ x) @ Vrc + bias'
    avg = slab_ref[pl.ds(off["avg"], B), pl.ds(0, NB)]         # (B, NB) mean matrix
    vrc = slab_ref[pl.ds(off["vrc"], d), pl.ds(0, C)]          # (d, C) = ro_w^T cls_w^T
    bias = slab_ref[pl.ds(off["bias"], 1), pl.ds(0, C)]        # (1, C)
    x_mean = jnp.dot(avg, x, preferred_element_type=f32)       # (B, d)
    out_ref[...] = (jnp.dot(x_mean, vrc, preferred_element_type=f32)
                    + bias).astype(out_ref.dtype)


# -----------------------------------------------------------------------------
# Wrapper: parameter packing + the single (grid-less) pallas_call
# -----------------------------------------------------------------------------
def akorn_classifier_forward(x, params):
    B = x.shape[0]
    N, d, C, IN = NUM_OSC, D, NUM_CLASSES, INPUT_DIM
    NB = N * B
    f32 = jnp.float32
    off, n_rows, LW = _slab_layout(N, B, IN, d, C)

    # Parameter-only packing (layout prep; no data compute moved out of kernel).
    wfc_stack = (params["fc_w"].T.reshape(IN, N, d)
                 .transpose(1, 0, 2).reshape(N * IN, d))                # (N*IN, d)
    bfc_exp = jnp.repeat(params["fc_b"].reshape(N, d), B, axis=0)       # (NB, d)
    Wk = jnp.kron(params["W"], jnp.eye(B, dtype=f32))                   # (NB, NB)
    wki = jnp.concatenate([Wk, jnp.eye(NB, dtype=f32)], axis=1)         # (NB, 2NB)
    Omega = params["A"] - params["A"].T                                 # (d, d)
    h_exp = jnp.repeat(params["h"], B, axis=0)                          # (NB, d)
    rhs_static = jnp.concatenate(
        [Omega, jnp.zeros((NB, d), f32), h_exp], axis=0)                # (d+2NB, d)
    vrc = params["ro_w"].T @ params["cls_w"].T                          # (d, C)
    bias_rc = (params["cls_w"][:, 0] * params["ro_b"][0]
               + params["cls_b"]).reshape(1, C)                         # (1, C)
    avg = jnp.kron(jnp.ones((1, N), f32) / N, jnp.eye(B, dtype=f32))    # (B, NB)
    mask = jnp.kron(jnp.eye(N, dtype=f32), jnp.ones((B, IN), f32))      # (NB, N*IN)
    tile_mat = jnp.concatenate([jnp.eye(IN, dtype=f32)] * N, axis=1)    # (IN, N*IN)

    def padw(a):
        a = a.astype(f32)
        return jnp.pad(a, ((0, 0), (0, LW - a.shape[1])))

    pieces = {"wfc": wfc_stack, "bfc": bfc_exp, "wki": wki, "rhs": rhs_static,
              "vrc": vrc, "avg": avg, "bias": bias_rc, "mask": mask,
              "tile": tile_mat}
    slab = jnp.concatenate(
        [padw(pieces[k]) for k in sorted(pieces, key=lambda k: off[k])], axis=0)
    assert slab.shape == (n_rows, LW)

    eta = params["eta"].reshape(1, 1).astype(f32)                       # SMEM scalar

    kern = functools.partial(
        akorn_fused_kernel, num_steps=NUM_STEPS, num_osc=N, batch=B,
        input_dim=IN, d=d, num_classes=C)

    return pl.pallas_call(
        kern,
        out_shape=jax.ShapeDtypeStruct((B, C), f32),
        in_specs=[
            pl.BlockSpec(memory_space=pltpu.MemorySpace.VMEM),   # x
            pl.BlockSpec(memory_space=pltpu.MemorySpace.VMEM),   # packed params
            pl.BlockSpec(memory_space=pltpu.MemorySpace.SMEM),   # eta (scalar)
        ],
        out_specs=pl.BlockSpec(memory_space=pltpu.MemorySpace.VMEM),
        scratch_shapes=[pltpu.VMEM((NB, d + 2 * NB), f32),       # merged-matmul LHS
                        pltpu.VMEM((d + 2 * NB, d), f32)],       # merged-matmul RHS
    )(x, slab, eta)


# -----------------------------------------------------------------------------
# Pure-JAX reference (mirrors the PyTorch forward semantics exactly)
# -----------------------------------------------------------------------------
def reference_forward(x, params):
    eps = 1e-12
    B = x.shape[0]
    fc = x @ params["fc_w"].T + params["fc_b"]
    xo = fc.reshape(B, NUM_OSC, D)
    xo = xo / jnp.maximum(jnp.linalg.norm(xo, axis=-1, keepdims=True), eps)
    Omega = params["A"] - params["A"].T
    for _ in range(NUM_STEPS):
        inter = jnp.einsum("ij,bjd->bid", params["W"], xo)
        nat = jnp.einsum("bnd,de->bne", xo, Omega)
        drive = nat + inter + params["h"][None]
        dot = jnp.sum(xo * drive, axis=-1, keepdims=True)
        xo = xo + params["eta"] * (drive - dot * xo)
        xo = xo / jnp.maximum(jnp.linalg.norm(xo, axis=-1, keepdims=True), eps)
    out = xo @ params["ro_w"].T + params["ro_b"]   # (B, N, 1)
    out = out.mean(axis=1)                         # (B, 1)
    return out @ params["cls_w"].T + params["cls_b"]


# -----------------------------------------------------------------------------
# Deterministic parameter init (shapes follow the PyTorch __init__)
# -----------------------------------------------------------------------------
def init_params(key):
    ks = jax.random.split(key, 9)
    f32 = jnp.float32
    return {
        "fc_w": 0.1 * jax.random.normal(ks[0], (NUM_OSC * D, INPUT_DIM), f32),
        "fc_b": 0.1 * jax.random.normal(ks[1], (NUM_OSC * D,), f32),
        "eta": jnp.array(0.1, f32),
        "W": 0.1 * jax.random.normal(ks[2], (NUM_OSC, NUM_OSC), f32),
        "A": 0.1 * jax.random.normal(ks[3], (D, D), f32),
        "h": 0.1 * jax.random.normal(ks[4], (NUM_OSC, D), f32),
        "ro_w": 0.1 * jax.random.normal(ks[5], (1, D), f32),
        "ro_b": 0.1 * jax.random.normal(ks[6], (1,), f32),
        "cls_w": 0.1 * jax.random.normal(ks[7], (NUM_CLASSES, 1), f32),
        "cls_b": 0.1 * jax.random.normal(ks[8], (NUM_CLASSES,), f32),
    }


if __name__ == "__main__":
    key = jax.random.PRNGKey(0)
    pkey, xkey = jax.random.split(key)
    params = init_params(pkey)
    x = jax.random.normal(xkey, (BATCH, INPUT_DIM), jnp.float32)

    logits = akorn_classifier_forward(x, params)
    jax.block_until_ready(logits)

    ref = reference_forward(x, params)
    assert logits.shape == (BATCH, NUM_CLASSES)
    assert bool(jnp.allclose(logits, ref, rtol=1e-2, atol=1e-2)), (logits, ref)

    print("KERNEL_OK")
</pallas_src>

<mosaic_0001>
module attributes {stable_mosaic.version = 11 : i64} {
  func.func @akorn_fused_kernel(%arg0: memref<2x16xf32, #tpu.memory_space<vmem>>, %arg1: memref<291x128xf32, #tpu.memory_space<vmem>>, %arg2: memref<1x1xf32, #tpu.memory_space<smem>>, %arg3: memref<2x4xf32, #tpu.memory_space<vmem>>, %arg4: memref<16x64xf32, #tpu.memory_space<vmem>>, %arg5: memref<64x32xf32, #tpu.memory_space<vmem>>) attributes {dimension_semantics = [], scalar_prefetch = 0 : i64, scratch_operands = 2 : i64, tpu.core_type = #tpu.core_type<tc>} {
    %c0 = arith.constant 0 : index
    %c0_0 = arith.constant 0 : index
    %0 = memref.load %arg2[%c0, %c0_0] : memref<1x1xf32, #tpu.memory_space<smem>>
    %1 = arith.mulf %0, %0 : f32
    %c0_1 = arith.constant 0 : index
    %c0_2 = arith.constant 0 : index
    %2 = vector.load %arg0[%c0_1, %c0_2] : memref<2x16xf32, #tpu.memory_space<vmem>>, vector<2x16xf32>
    %3 = tpu.concatenate %2, %2, %2, %2, %2, %2, %2, %2 in 0 : vector<2x16xf32>, vector<2x16xf32>, vector<2x16xf32>, vector<2x16xf32>, vector<2x16xf32>, vector<2x16xf32>, vector<2x16xf32>, vector<2x16xf32> -> vector<16x16xf32>
    %c275 = arith.constant 275 : index
    %c0_3 = arith.constant 0 : index
    %4 = vector.load %arg1[%c275, %c0_3] : memref<291x128xf32, #tpu.memory_space<vmem>>, vector<16x128xf32>
    %c259 = arith.constant 259 : index
    %c0_4 = arith.constant 0 : index
    %5 = vector.load %arg1[%c259, %c0_4] : memref<291x128xf32, #tpu.memory_space<vmem>>, vector<16x128xf32>
    %cst = arith.constant dense<0.000000e+00> : vector<16x128xf32>
    %6 = tpu.matmul %3, %4, %cst {dimension_numbers = #tpu.dot_dimension_numbers<[1], [0], [0], [1], [0, 0, 1, 1], [], []>} : vector<16x16xf32>, vector<16x128xf32>, vector<16x128xf32> -> vector<16x128xf32>
    %7 = arith.mulf %6, %5 : vector<16x128xf32>
    %c0_5 = arith.constant 0 : index
    %c0_6 = arith.constant 0 : index
    %8 = vector.load %arg1[%c0_5, %c0_6] : memref<291x128xf32, #tpu.memory_space<vmem>>, vector<128x32xf32>
    %c128 = arith.constant 128 : index
    %c0_7 = arith.constant 0 : index
    %9 = vector.load %arg1[%c128, %c0_7] : memref<291x128xf32, #tpu.memory_space<vmem>>, vector<16x32xf32>
    %cst_8 = arith.constant dense<0.000000e+00> : vector<16x32xf32>
    %10 = tpu.matmul %7, %8, %cst_8 {dimension_numbers = #tpu.dot_dimension_numbers<[1], [0], [0], [1], [0, 0, 1, 1], [], []>} : vector<16x128xf32>, vector<128x32xf32>, vector<16x32xf32> -> vector<16x32xf32>
    %11 = arith.addf %10, %9 : vector<16x32xf32>
    %12 = arith.mulf %11, %11 : vector<16x32xf32>
    %cst_9 = arith.constant dense<0.000000e+00> : vector<16xf32>
    %13 = vector.multi_reduction <add>, %12, %cst_9 [1] : vector<16x32xf32> to vector<16xf32>
    %14 = vector.shape_cast %13 : vector<16xf32> to vector<16x1xf32>
    %cst_10 = arith.constant 1.000000e-24 : f32
    %15 = vector.broadcast %cst_10 : f32 to vector<16x1xf32>
    %16 = arith.maximumf %14, %15 : vector<16x1xf32>
    %17 = math.rsqrt %16 : vector<16x1xf32>
    %18 = vector.broadcast %17 : vector<16x1xf32> to vector<16x32xf32>
    %19 = arith.mulf %11, %18 : vector<16x32xf32>
    %c144 = arith.constant 144 : index
    %c0_11 = arith.constant 0 : index
    %20 = vector.load %arg1[%c144, %c0_11] : memref<291x128xf32, #tpu.memory_space<vmem>>, vector<16x32xf32>
    %c0_12 = arith.constant 0 : index
    %c32 = arith.constant 32 : index
    %21 = vector.load %arg4[%c0_12, %c32] : memref<16x64xf32, #tpu.memory_space<vmem>>, vector<16x32xf32>
    tpu.vector_store %arg4[%c0_12, %c32], %20 {strides = array<i32>} : memref<16x64xf32, #tpu.memory_space<vmem>>, vector<16x32xf32>,
    %c160 = arith.constant 160 : index
    %c0_13 = arith.constant 0 : index
    %22 = vector.load %arg1[%c160, %c0_13] : memref<291x128xf32, #tpu.memory_space<vmem>>, vector<64x32xf32>
    %c0_14 = arith.constant 0 : index
    %c0_15 = arith.constant 0 : index
    %23 = vector.load %arg5[%c0_14, %c0_15] : memref<64x32xf32, #tpu.memory_space<vmem>>, vector<64x32xf32>
    tpu.vector_store %arg5[%c0_14, %c0_15], %22 {strides = array<i32>} : memref<64x32xf32, #tpu.memory_space<vmem>>, vector<64x32xf32>,
    %c0_16 = arith.constant 0 : index
    %c0_17 = arith.constant 0 : index
    %24 = vector.load %arg4[%c0_16, %c0_17] : memref<16x64xf32, #tpu.memory_space<vmem>>, vector<16x32xf32>
    tpu.vector_store %arg4[%c0_16, %c0_17], %19 {strides = array<i32>} : memref<16x64xf32, #tpu.memory_space<vmem>>, vector<16x32xf32>,
    %c32_18 = arith.constant 32 : index
    %c0_19 = arith.constant 0 : index
    %25 = vector.load %arg5[%c32_18, %c0_19] : memref<64x32xf32, #tpu.memory_space<vmem>>, vector<16x32xf32>
    tpu.vector_store %arg5[%c32_18, %c0_19], %19 {strides = array<i32>} : memref<64x32xf32, #tpu.memory_space<vmem>>, vector<16x32xf32>,
    %c0_20 = arith.constant 0 : index
    %c0_21 = arith.constant 0 : index
    %26 = vector.load %arg4[%c0_20, %c0_21] : memref<16x64xf32, #tpu.memory_space<vmem>>, vector<16x64xf32>
    %c0_22 = arith.constant 0 : index
    %c0_23 = arith.constant 0 : index
    %27 = vector.load %arg5[%c0_22, %c0_23] : memref<64x32xf32, #tpu.memory_space<vmem>>, vector<64x32xf32>
    %cst_24 = arith.constant dense<0.000000e+00> : vector<16x32xf32>
    %28 = tpu.matmul %26, %27, %cst_24 {dimension_numbers = #tpu.dot_dimension_numbers<[1], [0], [0], [1], [0, 0, 1, 1], [], []>} : vector<16x64xf32>, vector<64x32xf32>, vector<16x32xf32> -> vector<16x32xf32>
    %29 = arith.mulf %19, %28 : vector<16x32xf32>
    %cst_25 = arith.constant dense<0.000000e+00> : vector<16xf32>
    %30 = vector.multi_reduction <add>, %29, %cst_25 [1] : vector<16x32xf32> to vector<16xf32>
    %31 = vector.shape_cast %30 : vector<16xf32> to vector<16x1xf32>
    %32 = arith.mulf %28, %28 : vector<16x32xf32>
    %cst_26 = arith.constant dense<0.000000e+00> : vector<16xf32>
    %33 = vector.multi_reduction <add>, %32, %cst_26 [1] : vector<16x32xf32> to vector<16xf32>
    %34 = vector.shape_cast %33 : vector<16xf32> to vector<16x1xf32>
    %35 = arith.mulf %31, %31 : vector<16x1xf32>
    %36 = arith.subf %34, %35 : vector<16x1xf32>
    %37 = vector.broadcast %1 : f32 to vector<16x1xf32>
    %38 = arith.mulf %37, %36 : vector<16x1xf32>
    %cst_27 = arith.constant 1.000000e+00 : f32
    %39 = vector.broadcast %cst_27 : f32 to vector<16x1xf32>
    %40 = arith.addf %39, %38 : vector<16x1xf32>
    %41 = math.rsqrt %40 : vector<16x1xf32>
    %42 = vector.broadcast %31 : vector<16x1xf32> to vector<16x32xf32>
    %43 = arith.mulf %42, %19 : vector<16x32xf32>
    %44 = arith.subf %28, %43 : vector<16x32xf32>
    %45 = vector.broadcast %0 : f32 to vector<16x32xf32>
    %46 = arith.mulf %45, %44 : vector<16x32xf32>
    %47 = arith.addf %19, %46 : vector<16x32xf32>
    %48 = vector.broadcast %41 : vector<16x1xf32> to vector<16x32xf32>
    %49 = arith.mulf %47, %48 : vector<16x32xf32>
    %c0_28 = arith.constant 0 : index
    %c0_29 = arith.constant 0 : index
    %50 = vector.load %arg4[%c0_28, %c0_29] : memref<16x64xf32, #tpu.memory_space<vmem>>, vector<16x32xf32>
    tpu.vector_store %arg4[%c0_28, %c0_29], %49 {strides = array<i32>} : memref<16x64xf32, #tpu.memory_space<vmem>>, vector<16x32xf32>,
    %c32_30 = arith.constant 32 : index
    %c0_31 = arith.constant 0 : index
    %51 = vector.load %arg5[%c32_30, %c0_31] : memref<64x32xf32, #tpu.memory_space<vmem>>, vector<16x32xf32>
    tpu.vector_store %arg5[%c32_30, %c0_31], %49 {strides = array<i32>} : memref<64x32xf32, #tpu.memory_space<vmem>>, vector<16x32xf32>,
    %c0_32 = arith.constant 0 : index
    %c0_33 = arith.constant 0 : index
    %52 = vector.load %arg4[%c0_32, %c0_33] : memref<16x64xf32, #tpu.memory_space<vmem>>, vector<16x64xf32>
    %c0_34 = arith.constant 0 : index
    %c0_35 = arith.constant 0 : index
    %53 = vector.load %arg5[%c0_34, %c0_35] : memref<64x32xf32, #tpu.memory_space<vmem>>, vector<64x32xf32>
    %cst_36 = arith.constant dense<0.000000e+00> : vector<16x32xf32>
    %54 = tpu.matmul %52, %53, %cst_36 {dimension_numbers = #tpu.dot_dimension_numbers<[1], [0], [0], [1], [0, 0, 1, 1], [], []>} : vector<16x64xf32>, vector<64x32xf32>, vector<16x32xf32> -> vector<16x32xf32>
    %55 = arith.mulf %49, %54 : vector<16x32xf32>
    %cst_37 = arith.constant dense<0.000000e+00> : vector<16xf32>
    %56 = vector.multi_reduction <add>, %55, %cst_37 [1] : vector<16x32xf32> to vector<16xf32>
    %57 = vector.shape_cast %56 : vector<16xf32> to vector<16x1xf32>
    %58 = arith.mulf %54, %54 : vector<16x32xf32>
    %cst_38 = arith.constant dense<0.000000e+00> : vector<16xf32>
    %59 = vector.multi_reduction <add>, %58, %cst_38 [1] : vector<16x32xf32> to vector<16xf32>
    %60 = vector.shape_cast %59 : vector<16xf32> to vector<16x1xf32>
    %61 = arith.mulf %57, %57 : vector<16x1xf32>
    %62 = arith.subf %60, %61 : vector<16x1xf32>
    %63 = vector.broadcast %1 : f32 to vector<16x1xf32>
    %64 = arith.mulf %63, %62 : vector<16x1xf32>
    %cst_39 = arith.constant 1.000000e+00 : f32
    %65 = vector.broadcast %cst_39 : f32 to vector<16x1xf32>
    %66 = arith.addf %65, %64 : vector<16x1xf32>
    %67 = math.rsqrt %66 : vector<16x1xf32>
    %68 = vector.broadcast %57 : vector<16x1xf32> to vector<16x32xf32>
    %69 = arith.mulf %68, %49 : vector<16x32xf32>
    %70 = arith.subf %54, %69 : vector<16x32xf32>
    %71 = vector.broadcast %0 : f32 to vector<16x32xf32>
    %72 = arith.mulf %71, %70 : vector<16x32xf32>
    %73 = arith.addf %49, %72 : vector<16x32xf32>
    %74 = vector.broadcast %67 : vector<16x1xf32> to vector<16x32xf32>
    %75 = arith.mulf %73, %74 : vector<16x32xf32>
    %c0_40 = arith.constant 0 : index
    %c0_41 = arith.constant 0 : index
    %76 = vector.load %arg4[%c0_40, %c0_41] : memref<16x64xf32, #tpu.memory_space<vmem>>, vector<16x32xf32>
    tpu.vector_store %arg4[%c0_40, %c0_41], %75 {strides = array<i32>} : memref<16x64xf32, #tpu.memory_space<vmem>>, vector<16x32xf32>,
    %c32_42 = arith.constant 32 : index
    %c0_43 = arith.constant 0 : index
    %77 = vector.load %arg5[%c32_42, %c0_43] : memref<64x32xf32, #tpu.memory_space<vmem>>, vector<16x32xf32>
    tpu.vector_store %arg5[%c32_42, %c0_43], %75 {strides = array<i32>} : memref<64x32xf32, #tpu.memory_space<vmem>>, vector<16x32xf32>,
    %c0_44 = arith.constant 0 : index
    %c0_45 = arith.constant 0 : index
    %78 = vector.load %arg4[%c0_44, %c0_45] : memref<16x64xf32, #tpu.memory_space<vmem>>, vector<16x64xf32>
    %c0_46 = arith.constant 0 : index
    %c0_47 = arith.constant 0 : index
    %79 = vector.load %arg5[%c0_46, %c0_47] : memref<64x32xf32, #tpu.memory_space<vmem>>, vector<64x32xf32>
    %cst_48 = arith.constant dense<0.000000e+00> : vector<16x32xf32>
    %80 = tpu.matmul %78, %79, %cst_48 {dimension_numbers = #tpu.dot_dimension_numbers<[1], [0], [0], [1], [0, 0, 1, 1], [], []>} : vector<16x64xf32>, vector<64x32xf32>, vector<16x32xf32> -> vector<16x32xf32>
    %81 = arith.mulf %75, %80 : vector<16x32xf32>
    %cst_49 = arith.constant dense<0.000000e+00> : vector<16xf32>
    %82 = vector.multi_reduction <add>, %81, %cst_49 [1] : vector<16x32xf32> to vector<16xf32>
    %83 = vector.shape_cast %82 : vector<16xf32> to vector<16x1xf32>
    %84 = arith.mulf %80, %80 : vector<16x32xf32>
    %cst_50 = arith.constant dense<0.000000e+00> : vector<16xf32>
    %85 = vector.multi_reduction <add>, %84, %cst_50 [1] : vector<16x32xf32> to vector<16xf32>
    %86 = vector.shape_cast %85 : vector<16xf32> to vector<16x1xf32>
    %87 = arith.mulf %83, %83 : vector<16x1xf32>
    %88 = arith.subf %86, %87 : vector<16x1xf32>
    %89 = vector.broadcast %1 : f32 to vector<16x1xf32>
    %90 = arith.mulf %89, %88 : vector<16x1xf32>
    %cst_51 = arith.constant 1.000000e+00 : f32
    %91 = vector.broadcast %cst_51 : f32 to vector<16x1xf32>
    %92 = arith.addf %91, %90 : vector<16x1xf32>
    %93 = math.rsqrt %92 : vector<16x1xf32>
    %94 = vector.broadcast %83 : vector<16x1xf32> to vector<16x32xf32>
    %95 = arith.mulf %94, %75 : vector<16x32xf32>
    %96 = arith.subf %80, %95 : vector<16x32xf32>
    %97 = vector.broadcast %0 : f32 to vector<16x32xf32>
    %98 = arith.mulf %97, %96 : vector<16x32xf32>
    %99 = arith.addf %75, %98 : vector<16x32xf32>
    %100 = vector.broadcast %93 : vector<16x1xf32> to vector<16x32xf32>
    %101 = arith.mulf %99, %100 : vector<16x32xf32>
    %c0_52 = arith.constant 0 : index
    %c0_53 = arith.constant 0 : index
    %102 = vector.load %arg4[%c0_52, %c0_53] : memref<16x64xf32, #tpu.memory_space<vmem>>, vector<16x32xf32>
    tpu.vector_store %arg4[%c0_52, %c0_53], %101 {strides = array<i32>} : memref<16x64xf32, #tpu.memory_space<vmem>>, vector<16x32xf32>,
    %c32_54 = arith.constant 32 : index
    %c0_55 = arith.constant 0 : index
    %103 = vector.load %arg5[%c32_54, %c0_55] : memref<64x32xf32, #tpu.memory_space<vmem>>, vector<16x32xf32>
    tpu.vector_store %arg5[%c32_54, %c0_55], %101 {strides = array<i32>} : memref<64x32xf32, #tpu.memory_space<vmem>>, vector<16x32xf32>,
    %c0_56 = arith.constant 0 : index
    %c0_57 = arith.constant 0 : index
    %104 = vector.load %arg4[%c0_56, %c0_57] : memref<16x64xf32, #tpu.memory_space<vmem>>, vector<16x64xf32>
    %c0_58 = arith.constant 0 : index
    %c0_59 = arith.constant 0 : index
    %105 = vector.load %arg5[%c0_58, %c0_59] : memref<64x32xf32, #tpu.memory_space<vmem>>, vector<64x32xf32>
    %cst_60 = arith.constant dense<0.000000e+00> : vector<16x32xf32>
    %106 = tpu.matmul %104, %105, %cst_60 {dimension_numbers = #tpu.dot_dimension_numbers<[1], [0], [0], [1], [0, 0, 1, 1], [], []>} : vector<16x64xf32>, vector<64x32xf32>, vector<16x32xf32> -> vector<16x32xf32>
    %107 = arith.mulf %101, %106 : vector<16x32xf32>
    %cst_61 = arith.constant dense<0.000000e+00> : vector<16xf32>
    %108 = vector.multi_reduction <add>, %107, %cst_61 [1] : vector<16x32xf32> to vector<16xf32>
    %109 = vector.shape_cast %108 : vector<16xf32> to vector<16x1xf32>
    %110 = arith.mulf %106, %106 : vector<16x32xf32>
    %cst_62 = arith.constant dense<0.000000e+00> : vector<16xf32>
    %111 = vector.multi_reduction <add>, %110, %cst_62 [1] : vector<16x32xf32> to vector<16xf32>
    %112 = vector.shape_cast %111 : vector<16xf32> to vector<16x1xf32>
    %113 = arith.mulf %109, %109 : vector<16x1xf32>
    %114 = arith.subf %112, %113 : vector<16x1xf32>
    %115 = vector.broadcast %1 : f32 to vector<16x1xf32>
    %116 = arith.mulf %115, %114 : vector<16x1xf32>
    %cst_63 = arith.constant 1.000000e+00 : f32
    %117 = vector.broadcast %cst_63 : f32 to vector<16x1xf32>
    %118 = arith.addf %117, %116 : vector<16x1xf32>
    %119 = math.rsqrt %118 : vector<16x1xf32>
    %120 = vector.broadcast %109 : vector<16x1xf32> to vector<16x32xf32>
    %121 = arith.mulf %120, %101 : vector<16x32xf32>
    %122 = arith.subf %106, %121 : vector<16x32xf32>
    %123 = vector.broadcast %0 : f32 to vector<16x32xf32>
    %124 = arith.mulf %123, %122 : vector<16x32xf32>
    %125 = arith.addf %101, %124 : vector<16x32xf32>
    %126 = vector.broadcast %119 : vector<16x1xf32> to vector<16x32xf32>
    %127 = arith.mulf %125, %126 : vector<16x32xf32>
    %c0_64 = arith.constant 0 : index
    %c0_65 = arith.constant 0 : index
    %128 = vector.load %arg4[%c0_64, %c0_65] : memref<16x64xf32, #tpu.memory_space<vmem>>, vector<16x32xf32>
    tpu.vector_store %arg4[%c0_64, %c0_65], %127 {strides = array<i32>} : memref<16x64xf32, #tpu.memory_space<vmem>>, vector<16x32xf32>,
    %c32_66 = arith.constant 32 : index
    %c0_67 = arith.constant 0 : index
    %129 = vector.load %arg5[%c32_66, %c0_67] : memref<64x32xf32, #tpu.memory_space<vmem>>, vector<16x32xf32>
    tpu.vector_store %arg5[%c32_66, %c0_67], %127 {strides = array<i32>} : memref<64x32xf32, #tpu.memory_space<vmem>>, vector<16x32xf32>,
    %c0_68 = arith.constant 0 : index
    %c0_69 = arith.constant 0 : index
    %130 = vector.load %arg4[%c0_68, %c0_69] : memref<16x64xf32, #tpu.memory_space<vmem>>, vector<16x64xf32>
    %c0_70 = arith.constant 0 : index
    %c0_71 = arith.constant 0 : index
    %131 = vector.load %arg5[%c0_70, %c0_71] : memref<64x32xf32, #tpu.memory_space<vmem>>, vector<64x32xf32>
    %cst_72 = arith.constant dense<0.000000e+00> : vector<16x32xf32>
    %132 = tpu.matmul %130, %131, %cst_72 {dimension_numbers = #tpu.dot_dimension_numbers<[1], [0], [0], [1], [0, 0, 1, 1], [], []>} : vector<16x64xf32>, vector<64x32xf32>, vector<16x32xf32> -> vector<16x32xf32>
    %133 = arith.mulf %127, %132 : vector<16x32xf32>
    %cst_73 = arith.constant dense<0.000000e+00> : vector<16xf32>
    %134 = vector.multi_reduction <add>, %133, %cst_73 [1] : vector<16x32xf32> to vector<16xf32>
    %135 = vector.shape_cast %134 : vector<16xf32> to vector<16x1xf32>
    %136 = arith.mulf %132, %132 : vector<16x32xf32>
    %cst_74 = arith.constant dense<0.000000e+00> : vector<16xf32>
    %137 = vector.multi_reduction <add>, %136, %cst_74 [1] : vector<16x32xf32> to vector<16xf32>
    %138 = vector.shape_cast %137 : vector<16xf32> to vector<16x1xf32>
    %139 = arith.mulf %135, %135 : vector<16x1xf32>
    %140 = arith.subf %138, %139 : vector<16x1xf32>
    %141 = vector.broadcast %1 : f32 to vector<16x1xf32>
    %142 = arith.mulf %141, %140 : vector<16x1xf32>
    %cst_75 = arith.constant 1.000000e+00 : f32
    %143 = vector.broadcast %cst_75 : f32 to vector<16x1xf32>
    %144 = arith.addf %143, %142 : vector<16x1xf32>
    %145 = math.rsqrt %144 : vector<16x1xf32>
    %146 = vector.broadcast %135 : vector<16x1xf32> to vector<16x32xf32>
    %147 = arith.mulf %146, %127 : vector<16x32xf32>
    %148 = arith.subf %132, %147 : vector<16x32xf32>
    %149 = vector.broadcast %0 : f32 to vector<16x32xf32>
    %150 = arith.mulf %149, %148 : vector<16x32xf32>
    %151 = arith.addf %127, %150 : vector<16x32xf32>
    %152 = vector.broadcast %145 : vector<16x1xf32> to vector<16x32xf32>
    %153 = arith.mulf %151, %152 : vector<16x32xf32>
    %c0_76 = arith.constant 0 : index
    %c0_77 = arith.constant 0 : index
    %154 = vector.load %arg4[%c0_76, %c0_77] : memref<16x64xf32, #tpu.memory_space<vmem>>, vector<16x32xf32>
    tpu.vector_store %arg4[%c0_76, %c0_77], %153 {strides = array<i32>} : memref<16x64xf32, #tpu.memory_space<vmem>>, vector<16x32xf32>,
    %c32_78 = arith.constant 32 : index
    %c0_79 = arith.constant 0 : index
    %155 = vector.load %arg5[%c32_78, %c0_79] : memref<64x32xf32, #tpu.memory_space<vmem>>, vector<16x32xf32>
    tpu.vector_store %arg5[%c32_78, %c0_79], %153 {strides = array<i32>} : memref<64x32xf32, #tpu.memory_space<vmem>>, vector<16x32xf32>,
    %c0_80 = arith.constant 0 : index
    %c0_81 = arith.constant 0 : index
    %156 = vector.load %arg4[%c0_80, %c0_81] : memref<16x64xf32, #tpu.memory_space<vmem>>, vector<16x64xf32>
    %c0_82 = arith.constant 0 : index
    %c0_83 = arith.constant 0 : index
    %157 = vector.load %arg5[%c0_82, %c0_83] : memref<64x32xf32, #tpu.memory_space<vmem>>, vector<64x32xf32>
    %cst_84 = arith.constant dense<0.000000e+00> : vector<16x32xf32>
    %158 = tpu.matmul %156, %157, %cst_84 {dimension_numbers = #tpu.dot_dimension_numbers<[1], [0], [0], [1], [0, 0, 1, 1], [], []>} : vector<16x64xf32>, vector<64x32xf32>, vector<16x32xf32> -> vector<16x32xf32>
    %159 = arith.mulf %153, %158 : vector<16x32xf32>
    %cst_85 = arith.constant dense<0.000000e+00> : vector<16xf32>
    %160 = vector.multi_reduction <add>, %159, %cst_85 [1] : vector<16x32xf32> to vector<16xf32>
    %161 = vector.shape_cast %160 : vector<16xf32> to vector<16x1xf32>
    %162 = arith.mulf %158, %158 : vector<16x32xf32>
    %cst_86 = arith.constant dense<0.000000e+00> : vector<16xf32>
    %163 = vector.multi_reduction <add>, %162, %cst_86 [1] : vector<16x32xf32> to vector<16xf32>
    %164 = vector.shape_cast %163 : vector<16xf32> to vector<16x1xf32>
    %165 = arith.mulf %161, %161 : vector<16x1xf32>
    %166 = arith.subf %164, %165 : vector<16x1xf32>
    %167 = vector.broadcast %1 : f32 to vector<16x1xf32>
    %168 = arith.mulf %167, %166 : vector<16x1xf32>
    %cst_87 = arith.constant 1.000000e+00 : f32
    %169 = vector.broadcast %cst_87 : f32 to vector<16x1xf32>
    %170 = arith.addf %169, %168 : vector<16x1xf32>
    %171 = math.rsqrt %170 : vector<16x1xf32>
    %172 = vector.broadcast %161 : vector<16x1xf32> to vector<16x32xf32>
    %173 = arith.mulf %172, %153 : vector<16x32xf32>
    %174 = arith.subf %158, %173 : vector<16x32xf32>
    %175 = vector.broadcast %0 : f32 to vector<16x32xf32>
    %176 = arith.mulf %175, %174 : vector<16x32xf32>
    %177 = arith.addf %153, %176 : vector<16x32xf32>
    %178 = vector.broadcast %171 : vector<16x1xf32> to vector<16x32xf32>
    %179 = arith.mulf %177, %178 : vector<16x32xf32>
    %c0_88 = arith.constant 0 : index
    %c0_89 = arith.constant 0 : index
    %180 = vector.load %arg4[%c0_88, %c0_89] : memref<16x64xf32, #tpu.memory_space<vmem>>, vector<16x32xf32>
    tpu.vector_store %arg4[%c0_88, %c0_89], %179 {strides = array<i32>} : memref<16x64xf32, #tpu.memory_space<vmem>>, vector<16x32xf32>,
    %c32_90 = arith.constant 32 : index
    %c0_91 = arith.constant 0 : index
    %181 = vector.load %arg5[%c32_90, %c0_91] : memref<64x32xf32, #tpu.memory_space<vmem>>, vector<16x32xf32>
    tpu.vector_store %arg5[%c32_90, %c0_91], %179 {strides = array<i32>} : memref<64x32xf32, #tpu.memory_space<vmem>>, vector<16x32xf32>,
    %c0_92 = arith.constant 0 : index
    %c0_93 = arith.constant 0 : index
    %182 = vector.load %arg4[%c0_92, %c0_93] : memref<16x64xf32, #tpu.memory_space<vmem>>, vector<16x64xf32>
    %c0_94 = arith.constant 0 : index
    %c0_95 = arith.constant 0 : index
    %183 = vector.load %arg5[%c0_94, %c0_95] : memref<64x32xf32, #tpu.memory_space<vmem>>, vector<64x32xf32>
    %cst_96 = arith.constant dense<0.000000e+00> : vector<16x32xf32>
    %184 = tpu.matmul %182, %183, %cst_96 {dimension_numbers = #tpu.dot_dimension_numbers<[1], [0], [0], [1], [0, 0, 1, 1], [], []>} : vector<16x64xf32>, vector<64x32xf32>, vector<16x32xf32> -> vector<16x32xf32>
    %185 = arith.mulf %179, %184 : vector<16x32xf32>
    %cst_97 = arith.constant dense<0.000000e+00> : vector<16xf32>
    %186 = vector.multi_reduction <add>, %185, %cst_97 [1] : vector<16x32xf32> to vector<16xf32>
    %187 = vector.shape_cast %186 : vector<16xf32> to vector<16x1xf32>
    %188 = arith.mulf %184, %184 : vector<16x32xf32>
    %cst_98 = arith.constant dense<0.000000e+00> : vector<16xf32>
    %189 = vector.multi_reduction <add>, %188, %cst_98 [1] : vector<16x32xf32> to vector<16xf32>
    %190 = vector.shape_cast %189 : vector<16xf32> to vector<16x1xf32>
    %191 = arith.mulf %187, %187 : vector<16x1xf32>
    %192 = arith.subf %190, %191 : vector<16x1xf32>
    %193 = vector.broadcast %1 : f32 to vector<16x1xf32>
    %194 = arith.mulf %193, %192 : vector<16x1xf32>
    %cst_99 = arith.constant 1.000000e+00 : f32
    %195 = vector.broadcast %cst_99 : f32 to vector<16x1xf32>
    %196 = arith.addf %195, %194 : vector<16x1xf32>
    %197 = math.rsqrt %196 : vector<16x1xf32>
    %198 = vector.broadcast %187 : vector<16x1xf32> to vector<16x32xf32>
    %199 = arith.mulf %198, %179 : vector<16x32xf32>
    %200 = arith.subf %184, %199 : vector<16x32xf32>
    %201 = vector.broadcast %0 : f32 to vector<16x32xf32>
    %202 = arith.mulf %201, %200 : vector<16x32xf32>
    %203 = arith.addf %179, %202 : vector<16x32xf32>
    %204 = vector.broadcast %197 : vector<16x1xf32> to vector<16x32xf32>
    %205 = arith.mulf %203, %204 : vector<16x32xf32>
    %c0_100 = arith.constant 0 : index
    %c0_101 = arith.constant 0 : index
    %206 = vector.load %arg4[%c0_100, %c0_101] : memref<16x64xf32, #tpu.memory_space<vmem>>, vector<16x32xf32>
    tpu.vector_store %arg4[%c0_100, %c0_101], %205 {strides = array<i32>} : memref<16x64xf32, #tpu.memory_space<vmem>>, vector<16x32xf32>,
    %c32_102 = arith.constant 32 : index
    %c0_103 = arith.constant 0 : index
    %207 = vector.load %arg5[%c32_102, %c0_103] : memref<64x32xf32, #tpu.memory_space<vmem>>, vector<16x32xf32>
    tpu.vector_store %arg5[%c32_102, %c0_103], %205 {strides = array<i32>} : memref<64x32xf32, #tpu.memory_space<vmem>>, vector<16x32xf32>,
    %c0_104 = arith.constant 0 : index
    %c0_105 = arith.constant 0 : index
    %208 = vector.load %arg4[%c0_104, %c0_105] : memref<16x64xf32, #tpu.memory_space<vmem>>, vector<16x64xf32>
    %c0_106 = arith.constant 0 : index
    %c0_107 = arith.constant 0 : index
    %209 = vector.load %arg5[%c0_106, %c0_107] : memref<64x32xf32, #tpu.memory_space<vmem>>, vector<64x32xf32>
    %cst_108 = arith.constant dense<0.000000e+00> : vector<16x32xf32>
    %210 = tpu.matmul %208, %209, %cst_108 {dimension_numbers = #tpu.dot_dimension_numbers<[1], [0], [0], [1], [0, 0, 1, 1], [], []>} : vector<16x64xf32>, vector<64x32xf32>, vector<16x32xf32> -> vector<16x32xf32>
    %211 = arith.mulf %205, %210 : vector<16x32xf32>
    %cst_109 = arith.constant dense<0.000000e+00> : vector<16xf32>
    %212 = vector.multi_reduction <add>, %211, %cst_109 [1] : vector<16x32xf32> to vector<16xf32>
    %213 = vector.shape_cast %212 : vector<16xf32> to vector<16x1xf32>
    %214 = arith.mulf %210, %210 : vector<16x32xf32>
    %cst_110 = arith.constant dense<0.000000e+00> : vector<16xf32>
    %215 = vector.multi_reduction <add>, %214, %cst_110 [1] : vector<16x32xf32> to vector<16xf32>
    %216 = vector.shape_cast %215 : vector<16xf32> to vector<16x1xf32>
    %217 = arith.mulf %213, %213 : vector<16x1xf32>
    %218 = arith.subf %216, %217 : vector<16x1xf32>
    %219 = vector.broadcast %1 : f32 to vector<16x1xf32>
    %220 = arith.mulf %219, %218 : vector<16x1xf32>
    %cst_111 = arith.constant 1.000000e+00 : f32
    %221 = vector.broadcast %cst_111 : f32 to vector<16x1xf32>
    %222 = arith.addf %221, %220 : vector<16x1xf32>
    %223 = math.rsqrt %222 : vector<16x1xf32>
    %224 = vector.broadcast %213 : vector<16x1xf32> to vector<16x32xf32>
    %225 = arith.mulf %224, %205 : vector<16x32xf32>
    %226 = arith.subf %210, %225 : vector<16x32xf32>
    %227 = vector.broadcast %0 : f32 to vector<16x32xf32>
    %228 = arith.mulf %227, %226 : vector<16x32xf32>
    %229 = arith.addf %205, %228 : vector<16x32xf32>
    %230 = vector.broadcast %223 : vector<16x1xf32> to vector<16x32xf32>
    %231 = arith.mulf %229, %230 : vector<16x32xf32>
    %c0_112 = arith.constant 0 : index
    %c0_113 = arith.constant 0 : index
    %232 = vector.load %arg4[%c0_112, %c0_113] : memref<16x64xf32, #tpu.memory_space<vmem>>, vector<16x32xf32>
    tpu.vector_store %arg4[%c0_112, %c0_113], %231 {strides = array<i32>} : memref<16x64xf32, #tpu.memory_space<vmem>>, vector<16x32xf32>,
    %c32_114 = arith.constant 32 : index
    %c0_115 = arith.constant 0 : index
    %233 = vector.load %arg5[%c32_114, %c0_115] : memref<64x32xf32, #tpu.memory_space<vmem>>, vector<16x32xf32>
    tpu.vector_store %arg5[%c32_114, %c0_115], %231 {strides = array<i32>} : memref<64x32xf32, #tpu.memory_space<vmem>>, vector<16x32xf32>,
    %c0_116 = arith.constant 0 : index
    %c0_117 = arith.constant 0 : index
    %234 = vector.load %arg4[%c0_116, %c0_117] : memref<16x64xf32, #tpu.memory_space<vmem>>, vector<16x64xf32>
    %c0_118 = arith.constant 0 : index
    %c0_119 = arith.constant 0 : index
    %235 = vector.load %arg5[%c0_118, %c0_119] : memref<64x32xf32, #tpu.memory_space<vmem>>, vector<64x32xf32>
    %cst_120 = arith.constant dense<0.000000e+00> : vector<16x32xf32>
    %236 = tpu.matmul %234, %235, %cst_120 {dimension_numbers = #tpu.dot_dimension_numbers<[1], [0], [0], [1], [0, 0, 1, 1], [], []>} : vector<16x64xf32>, vector<64x32xf32>, vector<16x32xf32> -> vector<16x32xf32>
    %237 = arith.mulf %231, %236 : vector<16x32xf32>
    %cst_121 = arith.constant dense<0.000000e+00> : vector<16xf32>
    %238 = vector.multi_reduction <add>, %237, %cst_121 [1] : vector<16x32xf32> to vector<16xf32>
    %239 = vector.shape_cast %238 : vector<16xf32> to vector<16x1xf32>
    %240 = arith.mulf %236, %236 : vector<16x32xf32>
    %cst_122 = arith.constant dense<0.000000e+00> : vector<16xf32>
    %241 = vector.multi_reduction <add>, %240, %cst_122 [1] : vector<16x32xf32> to vector<16xf32>
    %242 = vector.shape_cast %241 : vector<16xf32> to vector<16x1xf32>
    %243 = arith.mulf %239, %239 : vector<16x1xf32>
    %244 = arith.subf %242, %243 : vector<16x1xf32>
    %245 = vector.broadcast %1 : f32 to vector<16x1xf32>
    %246 = arith.mulf %245, %244 : vector<16x1xf32>
    %cst_123 = arith.constant 1.000000e+00 : f32
    %247 = vector.broadcast %cst_123 : f32 to vector<16x1xf32>
    %248 = arith.addf %247, %246 : vector<16x1xf32>
    %249 = math.rsqrt %248 : vector<16x1xf32>
    %250 = vector.broadcast %239 : vector<16x1xf32> to vector<16x32xf32>
    %251 = arith.mulf %250, %231 : vector<16x32xf32>
    %252 = arith.subf %236, %251 : vector<16x32xf32>
    %253 = vector.broadcast %0 : f32 to vector<16x32xf32>
    %254 = arith.mulf %253, %252 : vector<16x32xf32>
    %255 = arith.addf %231, %254 : vector<16x32xf32>
    %256 = vector.broadcast %249 : vector<16x1xf32> to vector<16x32xf32>
    %257 = arith.mulf %255, %256 : vector<16x32xf32>
    %c0_124 = arith.constant 0 : index
    %c0_125 = arith.constant 0 : index
    %258 = vector.load %arg4[%c0_124, %c0_125] : memref<16x64xf32, #tpu.memory_space<vmem>>, vector<16x32xf32>
    tpu.vector_store %arg4[%c0_124, %c0_125], %257 {strides = array<i32>} : memref<16x64xf32, #tpu.memory_space<vmem>>, vector<16x32xf32>,
    %c32_126 = arith.constant 32 : index
    %c0_127 = arith.constant 0 : index
    %259 = vector.load %arg5[%c32_126, %c0_127] : memref<64x32xf32, #tpu.memory_space<vmem>>, vector<16x32xf32>
    tpu.vector_store %arg5[%c32_126, %c0_127], %257 {strides = array<i32>} : memref<64x32xf32, #tpu.memory_space<vmem>>, vector<16x32xf32>,
    %c0_128 = arith.constant 0 : index
    %c0_129 = arith.constant 0 : index
    %260 = vector.load %arg4[%c0_128, %c0_129] : memref<16x64xf32, #tpu.memory_space<vmem>>, vector<16x64xf32>
    %c0_130 = arith.constant 0 : index
    %c0_131 = arith.constant 0 : index
    %261 = vector.load %arg5[%c0_130, %c0_131] : memref<64x32xf32, #tpu.memory_space<vmem>>, vector<64x32xf32>
    %cst_132 = arith.constant dense<0.000000e+00> : vector<16x32xf32>
    %262 = tpu.matmul %260, %261, %cst_132 {dimension_numbers = #tpu.dot_dimension_numbers<[1], [0], [0], [1], [0, 0, 1, 1], [], []>} : vector<16x64xf32>, vector<64x32xf32>, vector<16x32xf32> -> vector<16x32xf32>
    %263 = arith.mulf %257, %262 : vector<16x32xf32>
    %cst_133 = arith.constant dense<0.000000e+00> : vector<16xf32>
    %264 = vector.multi_reduction <add>, %263, %cst_133 [1] : vector<16x32xf32> to vector<16xf32>
    %265 = vector.shape_cast %264 : vector<16xf32> to vector<16x1xf32>
    %266 = arith.mulf %262, %262 : vector<16x32xf32>
    %cst_134 = arith.constant dense<0.000000e+00> : vector<16xf32>
    %267 = vector.multi_reduction <add>, %266, %cst_134 [1] : vector<16x32xf32> to vector<16xf32>
    %268 = vector.shape_cast %267 : vector<16xf32> to vector<16x1xf32>
    %269 = arith.mulf %265, %265 : vector<16x1xf32>
    %270 = arith.subf %268, %269 : vector<16x1xf32>
    %271 = vector.broadcast %1 : f32 to vector<16x1xf32>
    %272 = arith.mulf %271, %270 : vector<16x1xf32>
    %cst_135 = arith.constant 1.000000e+00 : f32
    %273 = vector.broadcast %cst_135 : f32 to vector<16x1xf32>
    %274 = arith.addf %273, %272 : vector<16x1xf32>
    %275 = math.rsqrt %274 : vector<16x1xf32>
    %276 = vector.broadcast %265 : vector<16x1xf32> to vector<16x32xf32>
    %277 = arith.mulf %276, %257 : vector<16x32xf32>
    %278 = arith.subf %262, %277 : vector<16x32xf32>
    %279 = vector.broadcast %0 : f32 to vector<16x32xf32>
    %280 = arith.mulf %279, %278 : vector<16x32xf32>
    %281 = arith.addf %257, %280 : vector<16x32xf32>
    %282 = vector.broadcast %275 : vector<16x1xf32> to vector<16x32xf32>
    %283 = arith.mulf %281, %282 : vector<16x32xf32>
    %c256 = arith.constant 256 : index
    %c0_136 = arith.constant 0 : index
    %284 = vector.load %arg1[%c256, %c0_136] : memref<291x128xf32, #tpu.memory_space<vmem>>, vector<2x16xf32>
    %c224 = arith.constant 224 : index
    %c0_137 = arith.constant 0 : index
    %285 = vector.load %arg1[%c224, %c0_137] : memref<291x128xf32, #tpu.memory_space<vmem>>, vector<32x4xf32>
    %c258 = arith.constant 258 : index
    %c0_138 = arith.constant 0 : index
    %286 = vector.load %arg1[%c258, %c0_138] : memref<291x128xf32, #tpu.memory_space<vmem>>, vector<1x4xf32>
    %cst_139 = arith.constant dense<0.000000e+00> : vector<2x32xf32>
    %287 = tpu.matmul %284, %283, %cst_139 {dimension_numbers = #tpu.dot_dimension_numbers<[1], [0], [0], [1], [0, 0, 1, 1], [], []>} : vector<2x16xf32>, vector<16x32xf32>, vector<2x32xf32> -> vector<2x32xf32>
    %cst_140 = arith.constant dense<0.000000e+00> : vector<2x4xf32>
    %288 = tpu.matmul %287, %285, %cst_140 {dimension_numbers = #tpu.dot_dimension_numbers<[1], [0], [0], [1], [0, 0, 1, 1], [], []>} : vector<2x32xf32>, vector<32x4xf32>, vector<2x4xf32> -> vector<2x4xf32>
    %289 = vector.broadcast %286 : vector<1x4xf32> to vector<2x4xf32>
    %290 = arith.addf %288, %289 : vector<2x4xf32>
    %c0_141 = arith.constant 0 : index
    %c0_142 = arith.constant 0 : index
    %291 = vector.load %arg3[%c0_141, %c0_142] : memref<2x4xf32, #tpu.memory_space<vmem>>, vector<2x4xf32>
    tpu.vector_store %arg3[%c0_141, %c0_142], %290 {strides = array<i32>} : memref<2x4xf32, #tpu.memory_space<vmem>>, vector<2x4xf32>,
    return
  }
}

</mosaic_0001>

<bundles_post_ra>
// kernel: tpu_custom_call.1
= control target key start
LH: loop header
LB: loop body
LE: loop exit
PB: predicated region body
PF: predicated region fallthrough
CT: control target
= control target key end

     0   :  { %9 = vsyncpa [#allocation6], 0  ;;  %s2773_s0 = inlined_call_operand.vmem [shape: f32[2,16], index: 0, kind: input, shape index: {}]   ;;  %s2774_s1 = inlined_call_operand.hbm [shape: f32[291,128], index: 1, kind: input, shape index: {}]   ;;  %s2775_s2 = inlined_call_operand.<no memory space> [shape: f32[1,1], index: 2, kind: input, shape index: {}]   ;;  %s2776_s3 = inlined_call_operand.hbm [shape: f32[2,4], index: 3, kind: output, shape index: {}]  }
   0x1   :  { %10 = vsyncpa [#allocation7], 0  ;;  %s2464_s12 = smov [#allocation5]   ;;  %s2416_s16 = scalar_lea.hbm %s2774_s1, 4736 }
   0x2   :  { %s18_s13 = sshll.u32 %s2464_s12, 4  ;;  %p2417_p0 = scmp.ne.s32.totalorder %s2774_s1, %s2416_s16  ;;  %s19_s13 = int_to_ptr.vmem [resolvable:$true] %s18_s13 }
   0x3   :  { %p2420_p1 = scmp.lt.u32.totalorder %s2416_s16, %s2774_s1 }
   0x5   :  { %p2422_p2 = pnand %p2420_p1, %p2417_p0 }
   0x7   :  { %2425 = shalt.err (!%p2422_p2)
}
   0x8   :  { %s2426_s21 = scalar_lea.vmem %s19_s13, 4736  ;;  %p2431_p4 = scmp.lt.s32.totalorder %s19_s13, %s19_s13 }
   0x9   :  { %p2427_p3 = scmp.ne.s32.totalorder %s19_s13, %s2426_s21  ;;  %p2432_p5 = scmp.lt.s32.totalorder %s2426_s21, %s2426_s21 }
   0xb   :  { %p2433_p6 = por %p2432_p5, %p2431_p4 }
   0xd   :  { %p2434_p7 = pnand %p2433_p6, %p2427_p3 }
   0xf   :  { %2437 = shalt.err (!%p2434_p7)
}
  0x10   :  { %s2465_s22 = smov 128   ;;  %s2466_s23 = smov 8  }
  0x11   :  { %24 = dma.hbm_to_vmem [thread:$0]  %s2774_s1, 4736, %s19_s13, [#allocation6], %s2465_s22, %s2465_s22, %s2466_s23  }
  0x12   :  { %2460 = dma.done.wait [#allocation6], 4736  }
  0x13   :  { %2461 = vsyncadd [#allocation6], 4294962560  ;;  %v46_v0 = vld [vmem:[#allocation5 + $0x113] sm:$0xff]  ;;  %v47_v1 = vld [vmem:[#allocation5 + $0x11b] sm:$0xff]  ;;  %vm40_vm0 = vcmask 1041408   ;;  %vm42_vm1 = vcmask 1043456   ;;  %s31_s29 = smul.f32 %s2775_s2, %s2775_s2 }
  0x14   :  { %v32_v2 = vld [vmem:[%s2773_s0] sm:$0x3]  ;;  %v2159_v3 = vpack.c.bf16 %v47_v1, %v46_v0  ;;  %v131_v7 = vld [vmem:[#allocation5] sm:$0xff]  ;;  %v132_v8 = vld [vmem:[#allocation5 + $0x8] sm:$0xff]  ;;  %vm44_vm2 = vcmask 1045504   ;;  %vm50_vm3 = vcmask 130048  }
  0x15   :  { %v34_v4 = vrot.slane %v32_v2, 6  ;;  %v36_v5 = vrot.slane %v32_v2, 4  ;;  %v38_v6 = vrot.slane %v32_v2, 2  ;;  %v2163_v9 = vpack.c.bf16 %v132_v8, %v131_v7  ;;  %v133_v10 = vld [vmem:[#allocation5 + $0x10] sm:$0xff]  ;;  %v134_v11 = vld [vmem:[#allocation5 + $0x18] sm:$0xff]  ;;  %v135_v16 = vld [vmem:[#allocation5 + $0x20] sm:$0xff] }
  0x16   :  { %2160 = vmatprep.subr.bf16.mxu1 %v2159_v3  ;;  %v2167_v15 = vpack.c.bf16 %v134_v11, %v133_v10  ;;  %v136_v17 = vld [vmem:[#allocation5 + $0x28] sm:$0xff]  ;;  %v137_v19 = vld [vmem:[#allocation5 + $0x30] sm:$0xff]  ;;  %v138_v20 = vld [vmem:[#allocation5 + $0x38] sm:$0xff]  ;;  %vm226_vm4 = vcmask 261120   ;;  %s2467_s0 = smov 32   ;;  %vm249_vm5 = vcmask 523520  }
  0x17   :  { %v41_v12 = vsel %vm40_vm0, %v32_v2, %v34_v4  ;;  %2162 = vmatpush3.bf16.msra.mxu1 %v2159_v3  ;;  %v2171_v18 = vpack.c.bf16 %v136_v17, %v135_v16  ;;  %v2175_v21 = vpack.c.bf16 %v138_v20, %v137_v19  ;;  %v139_v22 = vld [vmem:[#allocation5 + $0x40] sm:$0xff]  ;;  %v140_v23 = vld [vmem:[#allocation5 + $0x48] sm:$0xff]  ;;  %v141_v25 = vld [vmem:[#allocation5 + $0x50] sm:$0xff]  ;;  %vm282_vm6 = vcmask 523264  }
  0x18   :  { %v43_v13 = vsel %vm42_vm1, %v41_v12, %v36_v5  ;;  %2164 = vmatprep.subr.bf16.mxu1 %v2163_v9  ;;  %v2179_v24 = vpack.c.bf16 %v140_v23, %v139_v22  ;;  %v142_v26 = vld [vmem:[#allocation5 + $0x58] sm:$0xff]  ;;  %v143_v28 = vld [vmem:[#allocation5 + $0x60] sm:$0xff]  ;;  %v144_v29 = vld [vmem:[#allocation5 + $0x68] sm:$0xff]  ;;  %vm2469_vm7 = vmmov 0   ;;  %vm1737_vm8 = vcmask 25600  }
  0x19   :  { %v45_v14 = vsel %vm44_vm2, %v43_v13, %v38_v6  ;;  %v2183_v27 = vpack.c.bf16 %v142_v26, %v141_v25  ;;  %v2187_v30 = vpack.c.bf16 %v144_v29, %v143_v28  ;;  %v145_v31 = vld [vmem:[#allocation5 + $0x70] sm:$0xff]  ;;  %v146_v32 = vld [vmem:[#allocation5 + $0x78] sm:$0xff]  ;;  %v48_v34 = vld [vmem:[#allocation5 + $0x103] sm:$0xff] }
  0x1a   :  { %1913 = vmatprep.mubr.msk.f32.mxu1 %vm50_vm3, %v45_v14  ;;  %v2191_v33 = vpack.c.bf16 %v146_v32, %v145_v31  ;;  %v49_v35 = vld [vmem:[#allocation5 + $0x10b] sm:$0xff]  ;;  %v256_v41 = vld [vmem:[#allocation5 + $0xc0] sm:$0xff]  ;;  %v240_v42 = vld [vmem:[#allocation5 + $0x98] sm:$0xff] }
  0x1b   :  { %1914 = vmatmul.mubr.msk.f32.vlgmr.msra.gmra.mrb[0].mxu1 %vm50_vm3, %v45_v14  ;;  %v239_v40 = vld [vmem:[#allocation5 + $0x90] sm:$0xff]  ;;  %264 = vst.msk [vmem:[#allocation3 + $0x20] sm:$0xff] %vm226_vm4, %v256_v41  ;;  %v148_v43 = vld [vmem:[#allocation5 + $0x88] sm:$0xff]  ;;  %v147_v44 = vld [vmem:[#allocation5 + $0x80] sm:$0xff] }
  0x1c   :  { %2166 = vmatpush3.bf16.msra.mxu1 %v2163_v9  ;;  %243 = vrot.lane.b32.xlu1 %v239_v40, %s2467_s0  ;;  %v252_v53 = vld [vmem:[#allocation5 + $0xa0] sm:$0xff]  ;;  %v253_v54 = vld [vmem:[#allocation5 + $0xa8] sm:$0xff]  ;;  %v254_v56 = vld [vmem:[#allocation5 + $0xb0] sm:$0xff] }
  0x1d   :  { %2168 = vmatprep.subr.bf16.mxu1 %v2167_v15  ;;  %260 = vst.msk [vmem:[#allocation3] sm:$0xff] %vm226_vm4, %v252_v53  ;;  %261 = vst.msk [vmem:[#allocation3 + $0x8] sm:$0xff] %vm226_vm4, %v253_v54  ;;  %v255_v57 = vld [vmem:[#allocation5 + $0xb8] sm:$0xff]  ;;  %v257_v58 = vld [vmem:[#allocation5 + $0xc8] sm:$0xff] }
  0x1e   :  { %262 = vst.msk [vmem:[#allocation3 + $0x10] sm:$0xff] %vm226_vm4, %v254_v56  ;;  %263 = vst.msk [vmem:[#allocation3 + $0x18] sm:$0xff] %vm226_vm4, %v255_v57  ;;  %v258_v1 = vld [vmem:[#allocation5 + $0xd0] sm:$0xff]  ;;  %v259_v3 = vld [vmem:[#allocation5 + $0xd8] sm:$0xff] }
  0x1f   :  { %265 = vst.msk [vmem:[#allocation3 + $0x28] sm:$0xff] %vm226_vm4, %v257_v58  ;;  %266 = vst.msk [vmem:[#allocation3 + $0x30] sm:$0xff] %vm226_vm4, %v258_v1 }
  0x20   :  { %2170 = vmatpush3.bf16.msra.mxu1 %v2167_v15  ;;  %245 = vrot.lane.b32.xlu1 %v240_v42, %s2467_s0  ;;  %267 = vst.msk [vmem:[#allocation3 + $0x38] sm:$0xff] %vm226_vm4, %v259_v3 }
  0x21   :  { %2172 = vmatprep.subr.bf16.mxu1 %v2171_v18 }
  0x24   :  { %2174 = vmatpush3.bf16.msra.mxu1 %v2171_v18  ;;  %v274_v60 = vld [vmem:[#allocation3] sm:$0xff]  ;;  %v275_v61 = vld [vmem:[#allocation3 + $0x8] sm:$0xff] }
  0x25   :  { %2176 = vmatprep.subr.bf16.mxu1 %v2175_v21  ;;  %v2517_v62 = vpack.c.bf16 %v275_v61, %v274_v60  ;;  %v276_v63 = vld [vmem:[#allocation3 + $0x10] sm:$0xff]  ;;  %v277_v0 = vld [vmem:[#allocation3 + $0x18] sm:$0xff] }
  0x26   :  { %v2523_v2 = vpack.c.bf16 %v277_v0, %v276_v63  ;;  %v280_v13 = vld [vmem:[#allocation3 + $0x30] sm:$0xff] }
  0x27   :  { %2196 = vmatprep.subr.bf16.mxu0 %v2517_v62  ;;  %v281_v14 = vld [vmem:[#allocation3 + $0x38] sm:$0xff] }
  0x28   :  { %2178 = vmatpush3.bf16.msra.mxu1 %v2175_v21  ;;  %2198 = vmatpush3.bf16.msra.mxu0 %v2517_v62  ;;  %v2540_v18 = vpack.c.bf16 %v281_v14, %v280_v13 }
  0x29   :  { %2180 = vmatprep.subr.bf16.mxu1 %v2179_v24  ;;  %2200 = vmatprep.subr.bf16.mxu0 %v2523_v2 }
  0x2c   :  { %2182 = vmatpush3.bf16.msra.mxu1 %v2179_v24  ;;  %2202 = vmatpush3.bf16.msra.mxu0 %v2523_v2 }
  0x2d   :  { %2184 = vmatprep.subr.bf16.mxu1 %v2183_v27 }
  0x30   :  { %2186 = vmatpush3.bf16.msra.mxu1 %v2183_v27 }
  0x31   :  { %2188 = vmatprep.subr.bf16.mxu1 %v2187_v30 }
  0x34   :  { %2190 = vmatpush3.bf16.msra.mxu1 %v2187_v30 }
  0x35   :  { %2192 = vmatprep.subr.bf16.mxu1 %v2191_v33 }
  0x38   :  { %2194 = vmatpush3.bf16.msra.mxu1 %v2191_v33  ;;  %v2558_v33 = vstv %s31_s29 }
  0x39   :  { %2228 = vmatprep.subr.bf16.mxu1 %v2517_v62 }
  0x8e   :  { %v244_v55 = vpop.permute.xlu1 %243 }
  0x8f   :  { %250 = vst.msk [vmem:[#allocation2] sm:$0xff] %vm249_vm5, %v244_v55 }
  0x92   :  { %v246_v59 = vpop.permute.xlu1 %245 }
  0x93   :  { %251 = vst.msk [vmem:[#allocation2 + $0x8] sm:$0xff] %vm249_vm5, %v246_v59 }
  0xee   :  { %v1915_v36 = vpop.f32.mrb[0].mxu1 }
  0xef   :  { %v120_v37 = vpop.f32.mrb[1].mxu1  ;;  %v130_v39 = vmul.f32 %v1915_v36, %v49_v35 }
  0xf0   :  { %v129_v38 = vmul.f32 %v120_v37, %v48_v34 }
  0xf2   :  { %1948 = vmatprep.mubr.f32.mxu1 %v129_v38 }
  0xf3   :  { %1949 = vmatmul.mubr.f32.vlgmr.msra.gmra.mrb[2].mxu1 %v130_v39 }
  0xf4   :  { %2230 = vmatpush3.bf16.msra.mxu1 %v2517_v62 }
  0xf5   :  { %2232 = vmatprep.subr.bf16.mxu1 %v2523_v2 }
  0xf8   :  { %2234 = vmatpush3.bf16.msra.mxu1 %v2523_v2 }
 0x1c6   :  { %v1950_v45 = vpop.f32.mrb[2].mxu1 }
 0x1c7   :  { %v215_v46 = vpop.f32.mrb[3].mxu1  ;;  %v221_v47 = vadd.f32 %v1950_v45, %v148_v43  ;;  %v2566_v45 = vstv %s2775_s2  ;;  %s2471_s2 = smov [#allocation8]  }
 0x1c8   :  { %v216_v48 = vadd.f32 %v215_v46, %v147_v44  ;;  %s1745_s5 = sshll.u32 %s2471_s2, 4  ;;  %s1746_s5 = int_to_ptr.vmem [resolvable:$true] %s1745_s5 }
 0x1c9   :  { %v225_v51 = vmul.f32 %v221_v47, %v221_v47  ;;  %s2438_s6 = scalar_lea.vmem %s1746_s5, 32  ;;  %p2443_p9 = scmp.lt.s32.totalorder %s1746_s5, %s1746_s5 }
 0x1ca   :  { %v224_v49 = vmul.f32 %v216_v48, %v216_v48  ;;  %p2439_p8 = scmp.ne.s32.totalorder %s1746_s5, %s2438_s6  ;;  %p2444_p10 = scmp.lt.s32.totalorder %s2438_s6, %s2438_s6 }
 0x1cb   :  { %v230_v52 = vsel %vm226_vm4, %v225_v51, 0.0 }
 0x1cc   :  { %v227_v50 = vsel %vm226_vm4, %v224_v49, 0.0  ;;  %p2445_p11 = por %p2444_p10, %p2443_p9 }
 0x1cd   :  { %228 = vadd.xlane.f32.xlu0 %v227_v50 }
 0x1ce   :  { %p2446_p12 = pnand %p2445_p11, %p2439_p8 }
 0x1d1   :  { %231 = vadd.xlane.f32.xlu0 %v230_v52 }
 0x25a   :  { %v229_v4 = vpop.xlane.xlu0 %228 }
 0x25b   :  { %v233_v5 = vmax.f32 %v229_v4, 1e-24 }
 0x25d   :  { %2372 = vrsqrt.f32 %v233_v5 }
 0x25e   :  { %v232_v6 = vpop.xlane.xlu0 %231 }
 0x25f   :  { %v234_v7 = vmax.f32 %v232_v6, 1e-24 }
 0x261   :  { %2374 = vrsqrt.f32 %v234_v7 }
 0x267   :  { %v2373_v8 = vpop.eup %2372 }
 0x268   :  { %v2531_v9 = vmul.f32 %v2373_v8, %v216_v48 }
 0x26a   :  { %270 = vst.msk [vmem:[#allocation3 + $0x20] sm:$0xff] %vm226_vm4, %v2531_v9  ;;  %268 = vst.msk [vmem:[#allocation2] sm:$0xff] %vm226_vm4, %v2531_v9 }
 0x26b   :  { %v2375_v10 = vpop.eup %2374 }
 0x26c   :  { %v238_v11 = vmul.f32 %v2375_v10, %v221_v47 }
 0x26e   :  { %271 = vst.msk [vmem:[#allocation3 + $0x28] sm:$0xff] %vm226_vm4, %v238_v11  ;;  %269 = vst.msk [vmem:[#allocation2 + $0x8] sm:$0xff] %vm226_vm4, %v238_v11 }
 0x271   :  { %v272_v12 = vld [vmem:[#allocation2] sm:$0xff]  ;;  %v278_v15 = vld [vmem:[#allocation3 + $0x20] sm:$0xff] }
 0x272   :  { %1967 = vmatprep.mubr.msk.f32.mxu0 %vm282_vm6, %v272_v12 }
 0x275   :  { %v279_v16 = vld [vmem:[#allocation3 + $0x28] sm:$0xff]  ;;  %v273_v19 = vld [vmem:[#allocation2 + $0x8] sm:$0xff] }
 0x276   :  { %v2203_v17 = vpack.c.bf16 %v279_v16, %v278_v15 }
 0x278   :  { %2204 = vmatprep.subr.bf16.mxu0 %v2203_v17 }
 0x279   :  { %2206 = vmatpush3.bf16.msra.mxu0 %v2203_v17 }
 0x27a   :  { %2208 = vmatprep.subr.bf16.mxu0 %v2540_v18 }
 0x27d   :  { %2210 = vmatpush3.bf16.msra.mxu0 %v2540_v18 }
 0x27e   :  { %2212 = vmatprep.subr.bf16.mxu0 %v2517_v62 }
 0x280   :  { %1968 = vmatmul.mubr.msk.f32.vlgmr.msra.gmra.mrb[0].mxu0 %vm282_vm6, %v273_v19 }
 0x281   :  { %2214 = vmatpush3.bf16.msra.mxu0 %v2517_v62 }
 0x282   :  { %2216 = vmatprep.subr.bf16.mxu0 %v2523_v2 }
 0x285   :  { %2218 = vmatpush3.bf16.msra.mxu0 %v2523_v2 }
 0x353   :  { %v1969_v20 = vpop.f32.mrb[0].mxu0 }
 0x354   :  { %v355_v21 = vpop.f32.mrb[1].mxu0  ;;  %v365_v22 = vmul.f32 %v1969_v20, %v238_v11  ;;  %v373_v28 = vmul.f32 %v1969_v20, %v1969_v20 }
 0x355   :  { %v364_v23 = vmul.f32 %v355_v21, %v2531_v9  ;;  %v372_v26 = vmul.f32 %v355_v21, %v355_v21 }
 0x356   :  { %v369_v24 = vsel %vm226_vm4, %v365_v22, 0.0  ;;  %v377_v29 = vsel %vm226_vm4, %v373_v28, 0.0 }
 0x357   :  { %370 = vadd.xlane.f32.xlu1 %v369_v24  ;;  %v366_v25 = vsel %vm226_vm4, %v364_v23, 0.0  ;;  %v374_v27 = vsel %vm226_vm4, %v372_v26, 0.0 }
 0x358   :  { %367 = vadd.xlane.f32.xlu0 %v366_v25 }
 0x35c   :  { %375 = vadd.xlane.f32.xlu0 %v374_v27 }
 0x360   :  { %378 = vadd.xlane.f32.xlu0 %v377_v29 }
 0x3e4   :  { %v371_v32 = vpop.xlane.xlu1 %370 }
 0x3e5   :  { %v368_v30 = vpop.xlane.xlu0 %367  ;;  %v381_v36 = vmul.f32 %v371_v32, %v371_v32  ;;  %v392_v43 = vmul.f32 %v371_v32, %v238_v11 }
 0x3e6   :  { %v380_v31 = vmul.f32 %v368_v30, %v368_v30  ;;  %v391_v38 = vmul.f32 %v368_v30, %v2531_v9 }
 0x3e7   :  { %v394_v47 = vsub.f32 %v1969_v20, %v392_v43 }
 0x3e8   :  { %v393_v44 = vsub.f32 %v355_v21, %v391_v38 }
 0x3e9   :  { %v376_v34 = vpop.xlane.xlu0 %375  ;;  %v397_v49 = vmul.f32 %v2566_v45, %v394_v47 }
 0x3ea   :  { %v382_v35 = vsub.f32 %v376_v34, %v380_v31  ;;  %v396_v48 = vmul.f32 %v2566_v45, %v393_v44 }
 0x3eb   :  { %v399_v53 = vadd.f32 %v397_v49, %v238_v11 }
 0x3ec   :  { %v385_v37 = vmul.f32 %v2558_v33, %v382_v35  ;;  %v398_v50 = vadd.f32 %v396_v48, %v2531_v9 }
 0x3ed   :  { %v379_v39 = vpop.xlane.xlu0 %378 }
 0x3ee   :  { %v387_v40 = vadd.f32 1.0, %v385_v37  ;;  %v383_v41 = vsub.f32 %v379_v39, %v381_v36 }
 0x3f0   :  { %2376 = vrsqrt.f32 %v387_v40  ;;  %v386_v42 = vmul.f32 %v2558_v33, %v383_v41 }
 0x3f2   :  { %v388_v46 = vadd.f32 1.0, %v386_v42 }
 0x3f4   :  { %2378 = vrsqrt.f32 %v388_v46 }
 0x3fa   :  { %v2377_v51 = vpop.eup %2376 }
 0x3fb   :  { %v400_v52 = vmul.f32 %v2377_v51, %v398_v50 }
 0x3fd   :  { %402 = vst.msk [vmem:[#allocation2] sm:$0xff] %vm226_vm4, %v400_v52  ;;  %404 = vst.msk [vmem:[#allocation3 + $0x20] sm:$0xff] %vm226_vm4, %v400_v52 }
 0x3fe   :  { %v2379_v54 = vpop.eup %2378 }
 0x3ff   :  { %v401_v55 = vmul.f32 %v2379_v54, %v399_v53 }
 0x401   :  { %403 = vst.msk [vmem:[#allocation2 + $0x8] sm:$0xff] %vm226_vm4, %v401_v55  ;;  %405 = vst.msk [vmem:[#allocation3 + $0x28] sm:$0xff] %vm226_vm4, %v401_v55 }
 0x404   :  { %v406_v56 = vld [vmem:[#allocation2] sm:$0xff]  ;;  %v412_v57 = vld [vmem:[#allocation3 + $0x20] sm:$0xff] }
 0x405   :  { %1986 = vmatprep.mubr.msk.f32.mxu0 %vm282_vm6, %v406_v56 }
 0x408   :  { %v413_v58 = vld [vmem:[#allocation3 + $0x28] sm:$0xff]  ;;  %v407_v60 = vld [vmem:[#allocation2 + $0x8] sm:$0xff] }
 0x409   :  { %v2219_v59 = vpack.c.bf16 %v413_v58, %v412_v57 }
 0x40b   :  { %2220 = vmatprep.subr.bf16.mxu0 %v2219_v59 }
 0x40c   :  { %2222 = vmatpush3.bf16.msra.mxu0 %v2219_v59 }
 0x40d   :  { %2224 = vmatprep.subr.bf16.mxu0 %v2540_v18 }
 0x410   :  { %2226 = vmatpush3.bf16.msra.mxu0 %v2540_v18 }
 0x411   :  { %2244 = vmatprep.subr.bf16.mxu0 %v2517_v62 }
 0x413   :  { %1987 = vmatmul.mubr.msk.f32.vlgmr.msra.gmra.mrb[2].mxu0 %vm282_vm6, %v407_v60 }
 0x414   :  { %2246 = vmatpush3.bf16.msra.mxu0 %v2517_v62 }
 0x415   :  { %2248 = vmatprep.subr.bf16.mxu0 %v2523_v2 }
 0x418   :  { %2250 = vmatpush3.bf16.msra.mxu0 %v2523_v2 }
 0x4e6   :  { %v1988_v61 = vpop.f32.mrb[2].mxu0 }
 0x4e7   :  { %v488_v63 = vpop.f32.mrb[3].mxu0  ;;  %v498_v0 = vmul.f32 %v1988_v61, %v401_v55  ;;  %v506_v7 = vmul.f32 %v1988_v61, %v1988_v61 }
 0x4e8   :  { %v497_v3 = vmul.f32 %v488_v63, %v400_v52  ;;  %v505_v5 = vmul.f32 %v488_v63, %v488_v63 }
 0x4e9   :  { %v502_v1 = vsel %vm226_vm4, %v498_v0, 0.0  ;;  %v510_v8 = vsel %vm226_vm4, %v506_v7, 0.0 }
 0x4ea   :  { %503 = vadd.xlane.f32.xlu0 %v502_v1  ;;  %v499_v4 = vsel %vm226_vm4, %v497_v3, 0.0  ;;  %v507_v6 = vsel %vm226_vm4, %v505_v5, 0.0 }
 0x4ee   :  { %500 = vadd.xlane.f32.xlu0 %v499_v4 }
 0x4f2   :  { %508 = vadd.xlane.f32.xlu0 %v507_v6 }
 0x4f6   :  { %511 = vadd.xlane.f32.xlu0 %v510_v8 }
 0x577   :  { %v504_v9 = vpop.xlane.xlu0 %503 }
 0x578   :  { %v514_v14 = vmul.f32 %v504_v9, %v504_v9  ;;  %v524_v22 = vmul.f32 %v504_v9, %v401_v55 }
 0x57a   :  { %v526_v25 = vsub.f32 %v1988_v61, %v524_v22 }
 0x57b   :  { %v501_v10 = vpop.xlane.xlu0 %500 }
 0x57c   :  { %v513_v11 = vmul.f32 %v501_v10, %v501_v10  ;;  %v523_v16 = vmul.f32 %v501_v10, %v400_v52  ;;  %v528_v27 = vmul.f32 %v526_v25, %v2566_v45 }
 0x57e   :  { %v525_v23 = vsub.f32 %v488_v63, %v523_v16  ;;  %v530_v31 = vadd.f32 %v528_v27, %v401_v55 }
 0x57f   :  { %v509_v12 = vpop.xlane.xlu0 %508 }
 0x580   :  { %v515_v13 = vsub.f32 %v509_v12, %v513_v11  ;;  %v527_v26 = vmul.f32 %v525_v23, %v2566_v45 }
 0x582   :  { %v517_v15 = vmul.f32 %v515_v13, %v2558_v33  ;;  %v529_v28 = vadd.f32 %v527_v26, %v400_v52 }
 0x583   :  { %v512_v17 = vpop.xlane.xlu0 %511 }
 0x584   :  { %v519_v19 = vadd.f32 1.0, %v517_v15  ;;  %v516_v20 = vsub.f32 %v512_v17, %v514_v14 }
 0x586   :  { %2380 = vrsqrt.f32 %v519_v19  ;;  %v518_v21 = vmul.f32 %v516_v20, %v2558_v33 }
 0x588   :  { %v520_v24 = vadd.f32 1.0, %v518_v21 }
 0x58a   :  { %2382 = vrsqrt.f32 %v520_v24 }
 0x590   :  { %v2381_v29 = vpop.eup %2380 }
 0x591   :  { %v531_v30 = vmul.f32 %v2381_v29, %v529_v28 }
 0x593   :  { %533 = vst.msk [vmem:[#allocation2] sm:$0xff] %vm226_vm4, %v531_v30  ;;  %535 = vst.msk [vmem:[#allocation3 + $0x20] sm:$0xff] %vm226_vm4, %v531_v30 }
 0x594   :  { %v2383_v32 = vpop.eup %2382 }
 0x595   :  { %v532_v34 = vmul.f32 %v2383_v32, %v530_v31 }
 0x597   :  { %534 = vst.msk [vmem:[#allocation2 + $0x8] sm:$0xff] %vm226_vm4, %v532_v34  ;;  %536 = vst.msk [vmem:[#allocation3 + $0x28] sm:$0xff] %vm226_vm4, %v532_v34 }
 0x59a   :  { %v537_v35 = vld [vmem:[#allocation2] sm:$0xff]  ;;  %v543_v36 = vld [vmem:[#allocation3 + $0x20] sm:$0xff] }
 0x59b   :  { %2005 = vmatprep.mubr.msk.f32.mxu1 %vm282_vm6, %v537_v35 }
 0x59e   :  { %v544_v37 = vld [vmem:[#allocation3 + $0x28] sm:$0xff]  ;;  %v538_v39 = vld [vmem:[#allocation2 + $0x8] sm:$0xff] }
 0x59f   :  { %v2235_v38 = vpack.c.bf16 %v544_v37, %v543_v36 }
 0x5a1   :  { %2236 = vmatprep.subr.bf16.mxu1 %v2235_v38 }
 0x5a2   :  { %2238 = vmatpush3.bf16.msra.mxu1 %v2235_v38 }
 0x5a3   :  { %2240 = vmatprep.subr.bf16.mxu1 %v2540_v18 }
 0x5a6   :  { %2242 = vmatpush3.bf16.msra.mxu1 %v2540_v18 }
 0x5a7   :  { %2260 = vmatprep.subr.bf16.mxu1 %v2517_v62 }
 0x5a9   :  { %2006 = vmatmul.mubr.msk.f32.vlgmr.msra.gmra.mrb[4].mxu1 %vm282_vm6, %v538_v39 }
 0x5aa   :  { %2262 = vmatpush3.bf16.msra.mxu1 %v2517_v62 }
 0x5ab   :  { %2264 = vmatprep.subr.bf16.mxu1 %v2523_v2 }
 0x5ae   :  { %2266 = vmatpush3.bf16.msra.mxu1 %v2523_v2 }
 0x67c   :  { %v2007_v40 = vpop.f32.mrb[4].mxu1 }
 0x67d   :  { %v619_v41 = vpop.f32.mrb[5].mxu1  ;;  %v637_v42 = vmul.f32 %v2007_v40, %v2007_v40  ;;  %v629_v43 = vmul.f32 %v2007_v40, %v532_v34 }
 0x67e   :  { %v628_v47 = vmul.f32 %v619_v41, %v531_v30  ;;  %v636_v49 = vmul.f32 %v619_v41, %v619_v41 }
 0x67f   :  { %v641_v44 = vsel %vm226_vm4, %v637_v42, 0.0  ;;  %v633_v46 = vsel %vm226_vm4, %v629_v43, 0.0 }
 0x680   :  { %642 = vadd.xlane.f32.xlu1 %v641_v44  ;;  %634 = vadd.xlane.f32.xlu0 %v633_v46  ;;  %v630_v48 = vsel %vm226_vm4, %v628_v47, 0.0  ;;  %v638_v50 = vsel %vm226_vm4, %v636_v49, 0.0 }
 0x684   :  { %631 = vadd.xlane.f32.xlu0 %v630_v48 }
 0x688   :  { %639 = vadd.xlane.f32.xlu0 %v638_v50 }
 0x70d   :  { %v635_v51 = vpop.xlane.xlu0 %634  ;;  %v643_v53 = vpop.xlane.xlu1 %642 }
 0x70e   :  { %v645_v52 = vmul.f32 %v635_v51, %v635_v51  ;;  %v655_v57 = vmul.f32 %v635_v51, %v532_v34 }
 0x710   :  { %v647_v54 = vsub.f32 %v643_v53, %v645_v52  ;;  %v657_v63 = vsub.f32 %v2007_v40, %v655_v57 }
 0x711   :  { %v632_v55 = vpop.xlane.xlu0 %631 }
 0x712   :  { %v649_v56 = vmul.f32 %v647_v54, %v2558_v33  ;;  %v644_v59 = vmul.f32 %v632_v55, %v632_v55  ;;  %v654_v1 = vmul.f32 %v632_v55, %v531_v30  ;;  %v659_v4 = vmul.f32 %v657_v63, %v2566_v45 }
 0x714   :  { %v651_v58 = vadd.f32 1.0, %v649_v56  ;;  %v656_v5 = vsub.f32 %v619_v41, %v654_v1  ;;  %v661_v6 = vadd.f32 %v659_v4, %v532_v34 }
 0x715   :  { %v640_v60 = vpop.xlane.xlu0 %639 }
 0x716   :  { %2384 = vrsqrt.f32 %v651_v58  ;;  %v646_v61 = vsub.f32 %v640_v60, %v644_v59  ;;  %v658_v9 = vmul.f32 %v656_v5, %v2566_v45 }
 0x718   :  { %v648_v0 = vmul.f32 %v646_v61, %v2558_v33  ;;  %v660_v10 = vadd.f32 %v658_v9, %v531_v30 }
 0x71a   :  { %v650_v3 = vadd.f32 1.0, %v648_v0 }
 0x71c   :  { %2386 = vrsqrt.f32 %v650_v3 }
 0x720   :  { %v2385_v7 = vpop.eup %2384 }
 0x721   :  { %v663_v8 = vmul.f32 %v2385_v7, %v661_v6 }
 0x723   :  { %665 = vst.msk [vmem:[#allocation2 + $0x8] sm:$0xff] %vm226_vm4, %v663_v8  ;;  %667 = vst.msk [vmem:[#allocation3 + $0x28] sm:$0xff] %vm226_vm4, %v663_v8 }
 0x726   :  { %v2387_v11 = vpop.eup %2386 }
 0x727   :  { %v662_v12 = vmul.f32 %v2387_v11, %v660_v10 }
 0x729   :  { %664 = vst.msk [vmem:[#allocation2] sm:$0xff] %vm226_vm4, %v662_v12  ;;  %666 = vst.msk [vmem:[#allocation3 + $0x20] sm:$0xff] %vm226_vm4, %v662_v12 }
 0x72a   :  { %v675_v15 = vld [vmem:[#allocation3 + $0x28] sm:$0xff]  ;;  %v669_v17 = vld [vmem:[#allocation2 + $0x8] sm:$0xff] }
 0x730   :  { %v668_v13 = vld [vmem:[#allocation2] sm:$0xff]  ;;  %v674_v14 = vld [vmem:[#allocation3 + $0x20] sm:$0xff] }
 0x731   :  { %2024 = vmatprep.mubr.msk.f32.mxu0 %vm282_vm6, %v668_v13  ;;  %v2251_v16 = vpack.c.bf16 %v675_v15, %v674_v14 }
 0x733   :  { %2252 = vmatprep.subr.bf16.mxu0 %v2251_v16 }
 0x734   :  { %2254 = vmatpush3.bf16.msra.mxu0 %v2251_v16 }
 0x735   :  { %2256 = vmatprep.subr.bf16.mxu0 %v2540_v18 }
 0x738   :  { %2258 = vmatpush3.bf16.msra.mxu0 %v2540_v18 }
 0x739   :  { %2276 = vmatprep.subr.bf16.mxu0 %v2517_v62 }
 0x73b   :  { %2025 = vmatmul.mubr.msk.f32.vlgmr.msra.gmra.mrb[4].mxu0 %vm282_vm6, %v669_v17 }
 0x73c   :  { %2278 = vmatpush3.bf16.msra.mxu0 %v2517_v62 }
 0x73d   :  { %2280 = vmatprep.subr.bf16.mxu0 %v2523_v2 }
 0x740   :  { %2282 = vmatpush3.bf16.msra.mxu0 %v2523_v2 }
 0x80e   :  { %v2026_v19 = vpop.f32.mrb[4].mxu0 }
 0x80f   :  { %v750_v20 = vpop.f32.mrb[5].mxu0  ;;  %v760_v21 = vmul.f32 %v2026_v19, %v663_v8  ;;  %v768_v24 = vmul.f32 %v2026_v19, %v2026_v19 }
 0x810   :  { %v759_v22 = vmul.f32 %v750_v20, %v662_v12  ;;  %v767_v26 = vmul.f32 %v750_v20, %v750_v20 }
 0x811   :  { %v764_v23 = vsel %vm226_vm4, %v760_v21, 0.0  ;;  %v772_v27 = vsel %vm226_vm4, %v768_v24, 0.0 }
 0x812   :  { %765 = vadd.xlane.f32.xlu1 %v764_v23  ;;  %v761_v25 = vsel %vm226_vm4, %v759_v22, 0.0  ;;  %v769_v28 = vsel %vm226_vm4, %v767_v26, 0.0 }
 0x813   :  { %762 = vadd.xlane.f32.xlu0 %v761_v25 }
 0x816   :  { %773 = vadd.xlane.f32.xlu1 %v772_v27 }
 0x817   :  { %770 = vadd.xlane.f32.xlu0 %v769_v28 }
 0x89f   :  { %v766_v29 = vpop.xlane.xlu1 %765 }
 0x8a0   :  { %v763_v30 = vpop.xlane.xlu0 %762  ;;  %v776_v31 = vmul.f32 %v766_v29, %v766_v29  ;;  %v786_v39 = vmul.f32 %v766_v29, %v663_v8 }
 0x8a1   :  { %v775_v32 = vmul.f32 %v763_v30, %v763_v30  ;;  %v785_v41 = vmul.f32 %v763_v30, %v662_v12 }
 0x8a2   :  { %v788_v44 = vsub.f32 %v2026_v19, %v786_v39 }
 0x8a3   :  { %v774_v34 = vpop.xlane.xlu1 %773  ;;  %v787_v46 = vsub.f32 %v750_v20, %v785_v41 }
 0x8a4   :  { %v778_v35 = vsub.f32 %v774_v34, %v776_v31  ;;  %v771_v36 = vpop.xlane.xlu0 %770  ;;  %v790_v47 = vmul.f32 %v788_v44, %v2566_v45 }
 0x8a5   :  { %v777_v37 = vsub.f32 %v771_v36, %v775_v32  ;;  %v789_v48 = vmul.f32 %v787_v46, %v2566_v45 }
 0x8a6   :  { %v780_v38 = vmul.f32 %v778_v35, %v2558_v33  ;;  %v792_v49 = vadd.f32 %v790_v47, %v663_v8 }
 0x8a7   :  { %v779_v40 = vmul.f32 %v777_v37, %v2558_v33  ;;  %v791_v51 = vadd.f32 %v789_v48, %v662_v12 }
 0x8a8   :  { %v782_v42 = vadd.f32 1.0, %v780_v38 }
 0x8a9   :  { %v781_v43 = vadd.f32 1.0, %v779_v40 }
 0x8aa   :  { %2388 = vrsqrt.f32 %v782_v42 }
 0x8ab   :  { %2390 = vrsqrt.f32 %v781_v43 }
 0x8b4   :  { %v2389_v50 = vpop.eup %2388 }
 0x8b5   :  { %v2391_v52 = vpop.eup %2390  ;;  %v794_v53 = vmul.f32 %v2389_v50, %v792_v49 }
 0x8b6   :  { %v793_v54 = vmul.f32 %v2391_v52, %v791_v51 }
 0x8b7   :  { %796 = vst.msk [vmem:[#allocation2 + $0x8] sm:$0xff] %vm226_vm4, %v794_v53  ;;  %798 = vst.msk [vmem:[#allocation3 + $0x28] sm:$0xff] %vm226_vm4, %v794_v53 }
 0x8b8   :  { %795 = vst.msk [vmem:[#allocation2] sm:$0xff] %vm226_vm4, %v793_v54  ;;  %797 = vst.msk [vmem:[#allocation3 + $0x20] sm:$0xff] %vm226_vm4, %v793_v54 }
 0x8be   :  { %v806_v55 = vld [vmem:[#allocation3 + $0x28] sm:$0xff]  ;;  %v800_v59 = vld [vmem:[#allocation2 + $0x8] sm:$0xff] }
 0x8bf   :  { %v799_v56 = vld [vmem:[#allocation2] sm:$0xff]  ;;  %v805_v57 = vld [vmem:[#allocation3 + $0x20] sm:$0xff] }
 0x8c0   :  { %2043 = vmatprep.mubr.msk.f32.mxu1 %vm282_vm6, %v799_v56  ;;  %v2267_v58 = vpack.c.bf16 %v806_v55, %v805_v57 }
 0x8c2   :  { %2268 = vmatprep.subr.bf16.mxu1 %v2267_v58 }
 0x8c3   :  { %2270 = vmatpush3.bf16.msra.mxu1 %v2267_v58 }
 0x8c4   :  { %2272 = vmatprep.subr.bf16.mxu1 %v2540_v18 }
 0x8c7   :  { %2274 = vmatpush3.bf16.msra.mxu1 %v2540_v18 }
 0x8c8   :  { %2292 = vmatprep.subr.bf16.mxu1 %v2517_v62 }
 0x8ca   :  { %2044 = vmatmul.mubr.msk.f32.vlgmr.msra.gmra.mrb[6].mxu1 %vm282_vm6, %v800_v59 }
 0x8cb   :  { %2294 = vmatpush3.bf16.msra.mxu1 %v2517_v62 }
 0x8cc   :  { %2296 = vmatprep.subr.bf16.mxu1 %v2523_v2 }
 0x8cf   :  { %2298 = vmatpush3.bf16.msra.mxu1 %v2523_v2 }
 0x99d   :  { %v2045_v60 = vpop.f32.mrb[6].mxu1 }
 0x99e   :  { %v881_v61 = vpop.f32.mrb[7].mxu1  ;;  %v891_v63 = vmul.f32 %v2045_v60, %v794_v53  ;;  %v899_v3 = vmul.f32 %v2045_v60, %v2045_v60 }
 0x99f   :  { %v890_v0 = vmul.f32 %v881_v61, %v793_v54  ;;  %v898_v5 = vmul.f32 %v881_v61, %v881_v61 }
 0x9a0   :  { %v895_v1 = vsel %vm226_vm4, %v891_v63, 0.0  ;;  %v903_v6 = vsel %vm226_vm4, %v899_v3, 0.0 }
 0x9a1   :  { %896 = vadd.xlane.f32.xlu1 %v895_v1  ;;  %v892_v4 = vsel %vm226_vm4, %v890_v0, 0.0  ;;  %v900_v7 = vsel %vm226_vm4, %v898_v5, 0.0 }
 0x9a2   :  { %893 = vadd.xlane.f32.xlu0 %v892_v4 }
 0x9a5   :  { %904 = vadd.xlane.f32.xlu1 %v903_v6 }
 0x9a6   :  { %901 = vadd.xlane.f32.xlu0 %v900_v7 }
 0xa2e   :  { %v897_v8 = vpop.xlane.xlu1 %896 }
 0xa2f   :  { %v894_v9 = vpop.xlane.xlu0 %893  ;;  %v907_v10 = vmul.f32 %v897_v8, %v897_v8  ;;  %v917_v17 = vmul.f32 %v897_v8, %v794_v53 }
 0xa30   :  { %v906_v11 = vmul.f32 %v894_v9, %v894_v9  ;;  %v916_v20 = vmul.f32 %v894_v9, %v793_v54 }
 0xa31   :  { %v919_v23 = vsub.f32 %v2045_v60, %v917_v17 }
 0xa32   :  { %v905_v12 = vpop.xlane.xlu1 %904  ;;  %v918_v24 = vsub.f32 %v881_v61, %v916_v20 }
 0xa33   :  { %v909_v13 = vsub.f32 %v905_v12, %v907_v10  ;;  %v902_v14 = vpop.xlane.xlu0 %901  ;;  %v921_v25 = vmul.f32 %v919_v23, %v2566_v45 }
 0xa34   :  { %v908_v15 = vsub.f32 %v902_v14, %v906_v11  ;;  %v920_v26 = vmul.f32 %v918_v24, %v2566_v45 }
 0xa35   :  { %v911_v16 = vmul.f32 %v909_v13, %v2558_v33  ;;  %v923_v27 = vadd.f32 %v921_v25, %v794_v53 }
 0xa36   :  { %v910_v19 = vmul.f32 %v908_v15, %v2558_v33  ;;  %v922_v29 = vadd.f32 %v920_v26, %v793_v54 }
 0xa37   :  { %v913_v21 = vadd.f32 1.0, %v911_v16 }
 0xa38   :  { %v912_v22 = vadd.f32 1.0, %v910_v19 }
 0xa39   :  { %2392 = vrsqrt.f32 %v913_v21 }
 0xa3a   :  { %2394 = vrsqrt.f32 %v912_v22 }
 0xa43   :  { %v2393_v28 = vpop.eup %2392 }
 0xa44   :  { %v2395_v30 = vpop.eup %2394  ;;  %v925_v31 = vmul.f32 %v2393_v28, %v923_v27 }
 0xa45   :  { %v924_v32 = vmul.f32 %v2395_v30, %v922_v29 }
 0xa46   :  { %927 = vst.msk [vmem:[#allocation2 + $0x8] sm:$0xff] %vm226_vm4, %v925_v31  ;;  %929 = vst.msk [vmem:[#allocation3 + $0x28] sm:$0xff] %vm226_vm4, %v925_v31 }
 0xa47   :  { %926 = vst.msk [vmem:[#allocation2] sm:$0xff] %vm226_vm4, %v924_v32  ;;  %928 = vst.msk [vmem:[#allocation3 + $0x20] sm:$0xff] %vm226_vm4, %v924_v32 }
 0xa4d   :  { %v937_v34 = vld [vmem:[#allocation3 + $0x28] sm:$0xff]  ;;  %v931_v38 = vld [vmem:[#allocation2 + $0x8] sm:$0xff] }
 0xa4e   :  { %v930_v35 = vld [vmem:[#allocation2] sm:$0xff]  ;;  %v936_v36 = vld [vmem:[#allocation3 + $0x20] sm:$0xff] }
 0xa4f   :  { %2062 = vmatprep.mubr.msk.f32.mxu0 %vm282_vm6, %v930_v35  ;;  %v2283_v37 = vpack.c.bf16 %v937_v34, %v936_v36 }
 0xa51   :  { %2284 = vmatprep.subr.bf16.mxu0 %v2283_v37 }
 0xa52   :  { %2286 = vmatpush3.bf16.msra.mxu0 %v2283_v37 }
 0xa53   :  { %2288 = vmatprep.subr.bf16.mxu0 %v2540_v18 }
 0xa56   :  { %2290 = vmatpush3.bf16.msra.mxu0 %v2540_v18 }
 0xa57   :  { %2308 = vmatprep.subr.bf16.mxu0 %v2517_v62 }
 0xa59   :  { %2063 = vmatmul.mubr.msk.f32.vlgmr.msra.gmra.mrb[6].mxu0 %vm282_vm6, %v931_v38 }
 0xa5a   :  { %2310 = vmatpush3.bf16.msra.mxu0 %v2517_v62 }
 0xa5b   :  { %2312 = vmatprep.subr.bf16.mxu0 %v2523_v2 }
 0xa5e   :  { %2314 = vmatpush3.bf16.msra.mxu0 %v2523_v2 }
 0xb2c   :  { %v2064_v39 = vpop.f32.mrb[6].mxu0 }
 0xb2d   :  { %v1012_v40 = vpop.f32.mrb[7].mxu0  ;;  %v1022_v41 = vmul.f32 %v2064_v39, %v925_v31  ;;  %v1030_v44 = vmul.f32 %v2064_v39, %v2064_v39 }
 0xb2e   :  { %v1021_v42 = vmul.f32 %v1012_v40, %v924_v32  ;;  %v1029_v47 = vmul.f32 %v1012_v40, %v1012_v40 }
 0xb2f   :  { %v1026_v43 = vsel %vm226_vm4, %v1022_v41, 0.0  ;;  %v1034_v48 = vsel %vm226_vm4, %v1030_v44, 0.0 }
 0xb30   :  { %1027 = vadd.xlane.f32.xlu1 %v1026_v43  ;;  %v1023_v46 = vsel %vm226_vm4, %v1021_v42, 0.0  ;;  %v1031_v62 = vsel %vm226_vm4, %v1029_v47, 0.0 }
 0xb31   :  { %1024 = vadd.xlane.f32.xlu0 %v1023_v46 }
 0xb34   :  { %1035 = vadd.xlane.f32.xlu1 %v1034_v48 }
 0xb35   :  { %1032 = vadd.xlane.f32.xlu0 %v1031_v62 }
 0xbbd   :  { %v1028_v49 = vpop.xlane.xlu1 %1027 }
 0xbbe   :  { %v1025_v2 = vpop.xlane.xlu0 %1024  ;;  %v1038_v50 = vmul.f32 %v1028_v49, %v1028_v49  ;;  %v1048_v57 = vmul.f32 %v1028_v49, %v925_v31 }
 0xbbf   :  { %v1037_v51 = vmul.f32 %v1025_v2, %v1025_v2  ;;  %v1047_v59 = vmul.f32 %v1025_v2, %v924_v32 }
 0xbc0   :  { %v1050_v63 = vsub.f32 %v2064_v39, %v1048_v57 }
 0xbc1   :  { %v1036_v52 = vpop.xlane.xlu1 %1035  ;;  %v1049_v0 = vsub.f32 %v1012_v40, %v1047_v59 }
 0xbc2   :  { %v1040_v53 = vsub.f32 %v1036_v52, %v1038_v50  ;;  %v1033_v54 = vpop.xlane.xlu0 %1032  ;;  %v1052_v1 = vmul.f32 %v1050_v63, %v2566_v45 }
 0xbc3   :  { %v1039_v55 = vsub.f32 %v1033_v54, %v1037_v51  ;;  %v1051_v3 = vmul.f32 %v1049_v0, %v2566_v45 }
 0xbc4   :  { %v1042_v56 = vmul.f32 %v1040_v53, %v2558_v33  ;;  %v1054_v4 = vadd.f32 %v1052_v1, %v925_v31  ;;  %v1325_v1 = vld [vmem:[#allocation3] sm:$0xff] }
 0xbc5   :  { %v1041_v58 = vmul.f32 %v1039_v55, %v2558_v33  ;;  %v1053_v6 = vadd.f32 %v1051_v3, %v924_v32  ;;  %v1326_v3 = vld [vmem:[#allocation3 + $0x8] sm:$0xff] }
 0xbc6   :  { %v1044_v60 = vadd.f32 1.0, %v1042_v56 }
 0xbc7   :  { %v1043_v61 = vadd.f32 1.0, %v1041_v58 }
 0xbc8   :  { %2396 = vrsqrt.f32 %v1044_v60 }
 0xbc9   :  { %2398 = vrsqrt.f32 %v1043_v61 }
 0xbd2   :  { %v2397_v5 = vpop.eup %2396 }
 0xbd3   :  { %v2399_v7 = vpop.eup %2398  ;;  %v1056_v8 = vmul.f32 %v2397_v5, %v1054_v4  ;;  %v2323_v4 = vpack.c.bf16 %v1326_v3, %v1325_v1  ;;  %v1327_v5 = vld [vmem:[#allocation3 + $0x10] sm:$0xff] }
 0xbd4   :  { %v1055_v9 = vmul.f32 %v2399_v7, %v1053_v6  ;;  %v1328_v6 = vld [vmem:[#allocation3 + $0x18] sm:$0xff] }
 0xbd5   :  { %1058 = vst.msk [vmem:[#allocation2 + $0x8] sm:$0xff] %vm226_vm4, %v1056_v8  ;;  %1060 = vst.msk [vmem:[#allocation3 + $0x28] sm:$0xff] %vm226_vm4, %v1056_v8  ;;  %v2327_v7 = vpack.c.bf16 %v1328_v6, %v1327_v5 }
 0xbd6   :  { %1057 = vst.msk [vmem:[#allocation2] sm:$0xff] %vm226_vm4, %v1055_v9  ;;  %1059 = vst.msk [vmem:[#allocation3 + $0x20] sm:$0xff] %vm226_vm4, %v1055_v9 }
 0xbdc   :  { %v1068_v10 = vld [vmem:[#allocation3 + $0x28] sm:$0xff]  ;;  %v1062_v14 = vld [vmem:[#allocation2 + $0x8] sm:$0xff] }
 0xbdd   :  { %v1061_v11 = vld [vmem:[#allocation2] sm:$0xff]  ;;  %v1067_v12 = vld [vmem:[#allocation3 + $0x20] sm:$0xff] }
 0xbde   :  { %2081 = vmatprep.mubr.msk.f32.mxu1 %vm282_vm6, %v1061_v11  ;;  %v2299_v13 = vpack.c.bf16 %v1068_v10, %v1067_v12 }
 0xbe0   :  { %2300 = vmatprep.subr.bf16.mxu1 %v2299_v13 }
 0xbe1   :  { %2302 = vmatpush3.bf16.msra.mxu1 %v2299_v13 }
 0xbe2   :  { %2304 = vmatprep.subr.bf16.mxu1 %v2540_v18 }
 0xbe5   :  { %2306 = vmatpush3.bf16.msra.mxu1 %v2540_v18 }
 0xbe6   :  { %2324 = vmatprep.subr.bf16.mxu1 %v2323_v4 }
 0xbe8   :  { %2082 = vmatmul.mubr.msk.f32.vlgmr.msra.gmra.mrb[8].mxu1 %vm282_vm6, %v1062_v14 }
 0xbe9   :  { %2326 = vmatpush3.bf16.msra.mxu1 %v2323_v4 }
 0xbea   :  { %2328 = vmatprep.subr.bf16.mxu1 %v2327_v7 }
 0xbed   :  { %2330 = vmatpush3.bf16.msra.mxu1 %v2327_v7 }
 0xcbb   :  { %v2083_v15 = vpop.f32.mrb[8].mxu1 }
 0xcbc   :  { %v1143_v16 = vpop.f32.mrb[9].mxu1  ;;  %v1153_v17 = vmul.f32 %v2083_v15, %v1056_v8  ;;  %v1161_v21 = vmul.f32 %v2083_v15, %v2083_v15 }
 0xcbd   :  { %v1152_v19 = vmul.f32 %v1143_v16, %v1055_v9  ;;  %v1160_v23 = vmul.f32 %v1143_v16, %v1143_v16 }
 0xcbe   :  { %v1157_v20 = vsel %vm226_vm4, %v1153_v17, 0.0  ;;  %v1165_v24 = vsel %vm226_vm4, %v1161_v21, 0.0 }
 0xcbf   :  { %1158 = vadd.xlane.f32.xlu1 %v1157_v20  ;;  %v1154_v22 = vsel %vm226_vm4, %v1152_v19, 0.0  ;;  %v1162_v25 = vsel %vm226_vm4, %v1160_v23, 0.0 }
 0xcc0   :  { %1155 = vadd.xlane.f32.xlu0 %v1154_v22 }
 0xcc3   :  { %1166 = vadd.xlane.f32.xlu1 %v1165_v24 }
 0xcc4   :  { %1163 = vadd.xlane.f32.xlu0 %v1162_v25 }
 0xd4c   :  { %v1159_v26 = vpop.xlane.xlu1 %1158 }
 0xd4d   :  { %v1156_v27 = vpop.xlane.xlu0 %1155  ;;  %v1169_v28 = vmul.f32 %v1159_v26, %v1159_v26  ;;  %v1179_v36 = vmul.f32 %v1159_v26, %v1056_v8 }
 0xd4e   :  { %v1168_v29 = vmul.f32 %v1156_v27, %v1156_v27  ;;  %v1178_v38 = vmul.f32 %v1156_v27, %v1055_v9 }
 0xd4f   :  { %v1181_v41 = vsub.f32 %v2083_v15, %v1179_v36 }
 0xd50   :  { %v1167_v30 = vpop.xlane.xlu1 %1166  ;;  %v1180_v42 = vsub.f32 %v1143_v16, %v1178_v38 }
 0xd51   :  { %v1171_v31 = vsub.f32 %v1167_v30, %v1169_v28  ;;  %v1164_v32 = vpop.xlane.xlu0 %1163  ;;  %v1183_v43 = vmul.f32 %v1181_v41, %v2566_v45 }
 0xd52   :  { %v1170_v34 = vsub.f32 %v1164_v32, %v1168_v29  ;;  %v1182_v44 = vmul.f32 %v1180_v42, %v2566_v45 }
 0xd53   :  { %v1173_v35 = vmul.f32 %v1171_v31, %v2558_v33  ;;  %v1185_v46 = vadd.f32 %v1183_v43, %v1056_v8 }
 0xd54   :  { %v1172_v37 = vmul.f32 %v1170_v34, %v2558_v33  ;;  %v1184_v48 = vadd.f32 %v1182_v44, %v1055_v9  ;;  %v1331_v34 = vld [vmem:[#allocation3 + $0x30] sm:$0xff] }
 0xd55   :  { %v1175_v39 = vadd.f32 1.0, %v1173_v35  ;;  %v1332_v35 = vld [vmem:[#allocation3 + $0x38] sm:$0xff] }
 0xd56   :  { %v1174_v40 = vadd.f32 1.0, %v1172_v37 }
 0xd57   :  { %2400 = vrsqrt.f32 %v1175_v39 }
 0xd58   :  { %2402 = vrsqrt.f32 %v1174_v40  ;;  %v2335_v40 = vpack.c.bf16 %v1332_v35, %v1331_v34  ;;  %v1585_v35 = vld [vmem:[#allocation5 + $0xf8] sm:$0xff] }
 0xd61   :  { %v2401_v47 = vpop.eup %2400 }
 0xd62   :  { %v2403_v62 = vpop.eup %2402  ;;  %v2687_v49 = vmul.f32 %v2401_v47, %v1185_v46 }
 0xd63   :  { %v2689_v2 = vmul.f32 %v2403_v62, %v1184_v48 }
 0xd64   :  { %1189 = vst.msk [vmem:[#allocation2 + $0x8] sm:$0xff] %vm226_vm4, %v2687_v49  ;;  %1191 = vst.msk [vmem:[#allocation3 + $0x28] sm:$0xff] %vm226_vm4, %v2687_v49 }
 0xd65   :  { %1188 = vst.msk [vmem:[#allocation2] sm:$0xff] %vm226_vm4, %v2689_v2  ;;  %1190 = vst.msk [vmem:[#allocation3 + $0x20] sm:$0xff] %vm226_vm4, %v2689_v2 }
 0xd6b   :  { %v1199_v50 = vld [vmem:[#allocation3 + $0x28] sm:$0xff]  ;;  %v1193_v54 = vld [vmem:[#allocation2 + $0x8] sm:$0xff] }
 0xd6c   :  { %v1192_v51 = vld [vmem:[#allocation2] sm:$0xff]  ;;  %v1198_v52 = vld [vmem:[#allocation3 + $0x20] sm:$0xff] }
 0xd6d   :  { %2100 = vmatprep.mubr.msk.f32.mxu0 %vm282_vm6, %v1192_v51  ;;  %v2315_v53 = vpack.c.bf16 %v1199_v50, %v1198_v52 }
 0xd6f   :  { %2316 = vmatprep.subr.bf16.mxu0 %v2315_v53 }
 0xd70   :  { %2318 = vmatpush3.bf16.msra.mxu0 %v2315_v53 }
 0xd71   :  { %2320 = vmatprep.subr.bf16.mxu0 %v2540_v18 }
 0xd74   :  { %2322 = vmatpush3.bf16.msra.mxu0 %v2540_v18 }
 0xd75   :  { %2340 = vmatprep.subr.bf16.mxu0 %v2323_v4 }
 0xd77   :  { %2101 = vmatmul.mubr.msk.f32.vlgmr.msra.gmra.mrb[8].mxu0 %vm282_vm6, %v1193_v54 }
 0xd78   :  { %2342 = vmatpush3.bf16.msra.mxu0 %v2323_v4 }
 0xd79   :  { %2344 = vmatprep.subr.bf16.mxu0 %v2327_v7 }
 0xd7c   :  { %2346 = vmatpush3.bf16.msra.mxu0 %v2327_v7 }
 0xe4a   :  { %v2102_v55 = vpop.f32.mrb[8].mxu0 }
 0xe4b   :  { %v1274_v56 = vpop.f32.mrb[9].mxu0  ;;  %v1284_v57 = vmul.f32 %v2102_v55, %v2687_v49  ;;  %v1292_v60 = vmul.f32 %v2102_v55, %v2102_v55 }
 0xe4c   :  { %v1283_v58 = vmul.f32 %v1274_v56, %v2689_v2  ;;  %v1291_v63 = vmul.f32 %v1274_v56, %v1274_v56 }
 0xe4d   :  { %v1288_v59 = vsel %vm226_vm4, %v1284_v57, 0.0  ;;  %v1296_v0 = vsel %vm226_vm4, %v1292_v60, 0.0 }
 0xe4e   :  { %1289 = vadd.xlane.f32.xlu1 %v1288_v59  ;;  %v1285_v61 = vsel %vm226_vm4, %v1283_v58, 0.0  ;;  %v1293_v18 = vsel %vm226_vm4, %v1291_v63, 0.0 }
 0xe4f   :  { %1286 = vadd.xlane.f32.xlu0 %v1285_v61 }
 0xe52   :  { %1297 = vadd.xlane.f32.xlu1 %v1296_v0 }
 0xe53   :  { %1294 = vadd.xlane.f32.xlu0 %v1293_v18 }
 0xedb   :  { %v1290_v8 = vpop.xlane.xlu1 %1289 }
 0xedc   :  { %v1287_v9 = vpop.xlane.xlu0 %1286  ;;  %v1300_v10 = vmul.f32 %v1290_v8, %v1290_v8  ;;  %v1310_v17 = vmul.f32 %v1290_v8, %v2687_v49 }
 0xedd   :  { %v1299_v11 = vmul.f32 %v1287_v9, %v1287_v9  ;;  %v1309_v20 = vmul.f32 %v1287_v9, %v2689_v2 }
 0xede   :  { %v1312_v23 = vsub.f32 %v2102_v55, %v1310_v17 }
 0xedf   :  { %v1298_v12 = vpop.xlane.xlu1 %1297  ;;  %v1311_v24 = vsub.f32 %v1274_v56, %v1309_v20 }
 0xee0   :  { %v1302_v13 = vsub.f32 %v1298_v12, %v1300_v10  ;;  %v1295_v14 = vpop.xlane.xlu0 %1294  ;;  %v1314_v25 = vmul.f32 %v1312_v23, %v2566_v45 }
 0xee1   :  { %v1301_v15 = vsub.f32 %v1295_v14, %v1299_v11  ;;  %v1313_v26 = vmul.f32 %v1311_v24, %v2566_v45 }
 0xee2   :  { %v1304_v16 = vmul.f32 %v1302_v13, %v2558_v33  ;;  %v1316_v27 = vadd.f32 %v1314_v25, %v2687_v49 }
 0xee3   :  { %v1303_v19 = vmul.f32 %v1301_v15, %v2558_v33  ;;  %v1315_v29 = vadd.f32 %v1313_v26, %v2689_v2 }
 0xee4   :  { %v1306_v21 = vadd.f32 1.0, %v1304_v16 }
 0xee5   :  { %v1305_v22 = vadd.f32 1.0, %v1303_v19 }
 0xee6   :  { %2404 = vrsqrt.f32 %v1306_v21 }
 0xee7   :  { %2406 = vrsqrt.f32 %v1305_v22 }
 0xef0   :  { %v2405_v28 = vpop.eup %2404 }
 0xef1   :  { %v2407_v30 = vpop.eup %2406  ;;  %v1318_v31 = vmul.f32 %v2405_v28, %v1316_v27  ;;  %v2468_v28 = vmov 0.0|0.0  }
 0xef2   :  { %v1317_v32 = vmul.f32 %v2407_v30, %v1315_v29  ;;  %v2470_v29 = vmov 0.0   ;;  %v1582_v30 = vld [vmem:[#allocation5 + $0xe0] sm:$0xff] }
 0xef3   :  { %1320 = vst.msk [vmem:[#allocation2 + $0x8] sm:$0xff] %vm226_vm4, %v1318_v31  ;;  %1322 = vst.msk [vmem:[#allocation3 + $0x28] sm:$0xff] %vm226_vm4, %v1318_v31 }
 0xef4   :  { %1319 = vst.msk [vmem:[#allocation2] sm:$0xff] %vm226_vm4, %v1317_v32  ;;  %1321 = vst.msk [vmem:[#allocation3 + $0x20] sm:$0xff] %vm226_vm4, %v1317_v32 }
 0xefa   :  { %v1330_v36 = vld [vmem:[#allocation3 + $0x28] sm:$0xff]  ;;  %v1324_v41 = vld [vmem:[#allocation2 + $0x8] sm:$0xff] }
 0xefb   :  { %v1323_v37 = vld [vmem:[#allocation2] sm:$0xff]  ;;  %v1329_v38 = vld [vmem:[#allocation3 + $0x20] sm:$0xff] }
 0xefc   :  { %2119 = vmatprep.mubr.msk.f32.mxu1 %vm282_vm6, %v1323_v37  ;;  %v2331_v39 = vpack.c.bf16 %v1330_v36, %v1329_v38 }
 0xefe   :  { %2332 = vmatprep.subr.bf16.mxu1 %v2331_v39 }
 0xeff   :  { %2334 = vmatpush3.bf16.msra.mxu1 %v2331_v39 }
 0xf00   :  { %2336 = vmatprep.subr.bf16.mxu1 %v2335_v40 }
 0xf03   :  { %2338 = vmatpush3.bf16.msra.mxu1 %v2335_v40 }
 0xf04   :  { %2355 = vmatprep.subr.bf16.mxu1 %v2468_v28 }
 0xf06   :  { %2120 = vmatmul.mubr.msk.f32.vlgmr.msra.gmra.mrb[10].mxu1 %vm282_vm6, %v1324_v41 }
 0xf07   :  { %2145 = vmatprep.mubr.msk.f32.mxu1 %vm2469_vm7, %v2470_v29 }
 0xfd9   :  { %v2121_v42 = vpop.f32.mrb[10].mxu1 }
 0xfda   :  { %v1405_v43 = vpop.f32.mrb[11].mxu1  ;;  %v1415_v44 = vmul.f32 %v2121_v42, %v1318_v31  ;;  %v1423_v48 = vmul.f32 %v2121_v42, %v2121_v42 }
 0xfdb   :  { %v1414_v46 = vmul.f32 %v1405_v43, %v1317_v32  ;;  %v1422_v49 = vmul.f32 %v1405_v43, %v1405_v43 }
 0xfdc   :  { %v1419_v47 = vsel %vm226_vm4, %v1415_v44, 0.0  ;;  %v1427_v2 = vsel %vm226_vm4, %v1423_v48, 0.0 }
 0xfdd   :  { %1420 = vadd.xlane.f32.xlu1 %v1419_v47  ;;  %v1416_v62 = vsel %vm226_vm4, %v1414_v46, 0.0  ;;  %v1424_v50 = vsel %vm226_vm4, %v1422_v49, 0.0 }
 0xfde   :  { %1417 = vadd.xlane.f32.xlu0 %v1416_v62 }
 0xfe1   :  { %1428 = vadd.xlane.f32.xlu1 %v1427_v2 }
 0xfe2   :  { %1425 = vadd.xlane.f32.xlu0 %v1424_v50 }
0x106a   :  { %v1421_v51 = vpop.xlane.xlu1 %1420 }
0x106b   :  { %v1418_v52 = vpop.xlane.xlu0 %1417  ;;  %v1431_v53 = vmul.f32 %v1421_v51, %v1421_v51  ;;  %v1441_v60 = vmul.f32 %v1421_v51, %v1318_v31 }
0x106c   :  { %v1430_v54 = vmul.f32 %v1418_v52, %v1418_v52  ;;  %v1440_v63 = vmul.f32 %v1418_v52, %v1317_v32 }
0x106d   :  { %v1443_v1 = vsub.f32 %v2121_v42, %v1441_v60  ;;  %v1581_v60 = vld [vmem:[#allocation5 + $0x100] sm:$0x3] }
0x106e   :  { %v1429_v55 = vpop.xlane.xlu1 %1428  ;;  %v1442_v3 = vsub.f32 %v1405_v43, %v1440_v63 }
0x106f   :  { %v1433_v56 = vsub.f32 %v1429_v55, %v1431_v53  ;;  %v1426_v57 = vpop.xlane.xlu0 %1425  ;;  %v1445_v4 = vmul.f32 %v1443_v1, %v2566_v45 }
0x1070   :  { %v1432_v58 = vsub.f32 %v1426_v57, %v1430_v54  ;;  %v1444_v5 = vmul.f32 %v1442_v3, %v2566_v45 }
0x1071   :  { %v1435_v59 = vmul.f32 %v1433_v56, %v2558_v33  ;;  %v1447_v6 = vadd.f32 %v1445_v4, %v1318_v31  ;;  %v1583_v31 = vld [vmem:[#allocation5 + $0xe8] sm:$0xff] }
0x1072   :  { %v1434_v61 = vmul.f32 %v1432_v58, %v2558_v33  ;;  %v1446_v8 = vadd.f32 %v1444_v5, %v1317_v32  ;;  %v1584_v32 = vld [vmem:[#allocation5 + $0xf0] sm:$0xff]  ;;  %v2359_v34 = vpack.c.bf16 %v1583_v31, %v1582_v30 }
0x1073   :  { %v1437_v0 = vadd.f32 1.0, %v1435_v59  ;;  %v2362_v36 = vpack.c.bf16 %v1585_v35, %v1584_v32 }
0x1074   :  { %v1436_v18 = vadd.f32 1.0, %v1434_v61 }
0x1075   :  { %2408 = vrsqrt.f32 %v1437_v0  ;;  %v1777_v0 = vld [vmem:[#allocation5 + $0x102] ss:$0 sm:$0xff] }
0x1076   :  { %2410 = vrsqrt.f32 %v1436_v18 }
0x107f   :  { %v2409_v7 = vpop.eup %2408 }
0x1080   :  { %v2411_v9 = vpop.eup %2410  ;;  %v2731_v10 = vmul.f32 %v2409_v7, %v1447_v6 }
0x1081   :  { %v2733_v11 = vmul.f32 %v2411_v9, %v1446_v8 }
0x1082   :  { %1451 = vst.msk [vmem:[#allocation2 + $0x8] sm:$0xff] %vm226_vm4, %v2731_v10  ;;  %1453 = vst.msk [vmem:[#allocation3 + $0x28] sm:$0xff] %vm226_vm4, %v2731_v10 }
0x1083   :  { %1450 = vst.msk [vmem:[#allocation2] sm:$0xff] %vm226_vm4, %v2733_v11  ;;  %1452 = vst.msk [vmem:[#allocation3 + $0x20] sm:$0xff] %vm226_vm4, %v2733_v11 }
0x1089   :  { %v1461_v12 = vld [vmem:[#allocation3 + $0x28] sm:$0xff]  ;;  %v1455_v16 = vld [vmem:[#allocation2 + $0x8] sm:$0xff] }
0x108a   :  { %v1454_v13 = vld [vmem:[#allocation2] sm:$0xff]  ;;  %v1460_v14 = vld [vmem:[#allocation3 + $0x20] sm:$0xff] }
0x108b   :  { %2138 = vmatprep.mubr.msk.f32.mxu0 %vm282_vm6, %v1454_v13  ;;  %v2347_v15 = vpack.c.bf16 %v1461_v12, %v1460_v14 }
0x108d   :  { %2348 = vmatprep.subr.bf16.mxu0 %v2347_v15 }
0x108e   :  { %2350 = vmatpush3.bf16.msra.mxu0 %v2347_v15 }
0x108f   :  { %2352 = vmatprep.subr.bf16.mxu0 %v2335_v40 }
0x1092   :  { %2354 = vmatpush3.bf16.msra.mxu0 %v2335_v40 }
0x1093   :  { %2358 = vmatprep.subr.bf16.mxu0 %v2468_v28 }
0x1095   :  { %2139 = vmatmul.mubr.msk.f32.vlgmr.msra.gmra.mrb[10].mxu0 %vm282_vm6, %v1455_v16 }
0x1096   :  { %2156 = vmatprep.mubr.msk.f32.mxu0 %vm2469_vm7, %v2470_v29  ;;  %2360 = vmatpush3.bf16.msra.mxu0 %v2359_v34 }
0x1097   :  { %2361 = vmatprep.subr.bf16.mxu0 %v2468_v28 }
0x109a   :  { %2363 = vmatpush3.bf16.msra.mxu0 %v2362_v36 }
0x1168   :  { %v2140_v17 = vpop.f32.mrb[10].mxu0 }
0x1169   :  { %v1536_v19 = vpop.f32.mrb[11].mxu0  ;;  %v1546_v20 = vmul.f32 %v2140_v17, %v2731_v10  ;;  %v1554_v23 = vmul.f32 %v2140_v17, %v2140_v17 }
0x116a   :  { %v1545_v21 = vmul.f32 %v1536_v19, %v2733_v11  ;;  %v1553_v25 = vmul.f32 %v1536_v19, %v1536_v19 }
0x116b   :  { %v1550_v22 = vsel %vm226_vm4, %v1546_v20, 0.0  ;;  %v1558_v26 = vsel %vm226_vm4, %v1554_v23, 0.0 }
0x116c   :  { %1551 = vadd.xlane.f32.xlu1 %v1550_v22  ;;  %v1547_v24 = vsel %vm226_vm4, %v1545_v21, 0.0  ;;  %v1555_v27 = vsel %vm226_vm4, %v1553_v25, 0.0 }
0x116d   :  { %1548 = vadd.xlane.f32.xlu0 %v1547_v24 }
0x1170   :  { %1559 = vadd.xlane.f32.xlu1 %v1558_v26 }
0x1171   :  { %1556 = vadd.xlane.f32.xlu0 %v1555_v27 }
0x11f9   :  { %v1552_v37 = vpop.xlane.xlu1 %1551 }
0x11fa   :  { %v1549_v38 = vpop.xlane.xlu0 %1548  ;;  %v1562_v39 = vmul.f32 %v1552_v37, %v1552_v37  ;;  %v1572_v47 = vmul.f32 %v1552_v37, %v2731_v10 }
0x11fb   :  { %v1561_v40 = vmul.f32 %v1549_v38, %v1549_v38  ;;  %v1571_v62 = vmul.f32 %v1549_v38, %v2733_v11 }
0x11fc   :  { %v1574_v50 = vsub.f32 %v2140_v17, %v1572_v47 }
0x11fd   :  { %v1560_v41 = vpop.xlane.xlu1 %1559  ;;  %v1573_v51 = vsub.f32 %v1536_v19, %v1571_v62 }
0x11fe   :  { %v1564_v42 = vsub.f32 %v1560_v41, %v1562_v39  ;;  %v1557_v43 = vpop.xlane.xlu0 %1556  ;;  %v1576_v52 = vmul.f32 %v1574_v50, %v2566_v45 }
0x11ff   :  { %v1563_v44 = vsub.f32 %v1557_v43, %v1561_v40  ;;  %v1575_v53 = vmul.f32 %v1573_v51, %v2566_v45 }
0x1200   :  { %v1566_v46 = vmul.f32 %v1564_v42, %v2558_v33  ;;  %v1578_v54 = vadd.f32 %v1576_v52, %v2731_v10 }
0x1201   :  { %v1565_v48 = vmul.f32 %v1563_v44, %v2558_v33  ;;  %v1577_v56 = vadd.f32 %v1575_v53, %v2733_v11 }
0x1202   :  { %v1568_v49 = vadd.f32 1.0, %v1566_v46 }
0x1203   :  { %v1567_v2 = vadd.f32 1.0, %v1565_v48 }
0x1204   :  { %2412 = vrsqrt.f32 %v1568_v49 }
0x1205   :  { %2414 = vrsqrt.f32 %v1567_v2 }
0x120e   :  { %v2413_v55 = vpop.eup %2412 }
0x120f   :  { %v2415_v57 = vpop.eup %2414  ;;  %v1580_v58 = vmul.f32 %v2413_v55, %v1578_v54 }
0x1210   :  { %v1579_v33 = vmul.f32 %v2415_v57, %v1577_v56 }
0x1212   :  { %v2356_v59 = vpack.c.bf16 %v1580_v58, %v1579_v33 }
0x1214   :  { %2357 = vmatpush3.bf16.msra.mxu1 %v2356_v59 }
0x1217   :  { %2146 = vmatmul.mubr.msk.f32.vlgmr.msra.gmra.mrb[12].mxu1 %vm50_vm3, %v1581_v60 }
0x12ea   :  { %v1656_v61 = vpop.f32.mrb[12].mxu1 }
0x12eb   :  { %v2147_v63 = vpop.f32.mrb[13].mxu1  ;;  %2157 = vmatmul.mubr.msk.f32.vlgmr.msra.gmra.mrb[12].mxu0 %vm226_vm4, %v1656_v61 }
0x13be   :  { %v1733_v45 = vpop.f32.mrb[12].mxu0 }
0x13bf   :  { %v1734_v18 = vadd.f32 %v1777_v0, %v1733_v45  ;;  %v2158_v1 = vpop.f32.mrb[13].mxu0 }
0x13c1   :  { %1738 = vst.msk [vmem:[#allocation8] sm:$0x3] %vm1737_vm8, %v1734_v18 }
0x13c2   :  { %2449 = shalt.err (!%p2446_p12)
}
0x13c3   :  { %s2450_s9 = scalar_lea.hbm %s2776_s3, 32 }
0x13c4   :  { %p2451_p13 = scmp.ne.s32.totalorder %s2776_s3, %s2450_s9  ;;  %p2454_p0 = scmp.lt.u32.totalorder %s2450_s9, %s2776_s3 }
0x13c6   :  { %p2456_p1 = pnand %p2454_p0, %p2451_p13 }
0x13c8   :  { %2459 = shalt.err (!%p2456_p1)
}
0x13c9   :  { %1748 = dma.vmem_to_hbm [thread:$0]  %s1746_s5, 32, %s2776_s3, [#allocation7]  }
0x13ca   :  { %2462 = dma.done.wait [#allocation7], 32  }
0x13cb   :  { %2463 = vsyncadd [#allocation7], 4294967264 }
0x13cc   :  { %1752 = vsyncpa [#allocation6], 1 }
0x13cd   :  { %1753 = vsyncpa [#allocation7], 1 }

</bundles_post_ra>
